<compile_context>
chip_gen: v7x
topology: tpu7x:2x2x1
jax: 0.10.0
libtpu: 0.0.40
codegen_flags: <defaults>
</compile_context>

<pallas_src>
import math
import numpy as np
import jax
import jax.numpy as jnp
from jax.experimental import pallas as pl
from jax.experimental.pallas import tpu as pltpu

# ---- model hyper-parameters (small, but GroupNorm(32, H) needs H % 32 == 0) ----
B    = 8          # batch
DX   = 4          # dim of x
DV   = 4          # dim of v
DIN  = DX + DV    # input_dim of FCnet (cat([x, v], -1))
DOUT = 4          # output_dim
H    = 128        # hidden_dim   (512 in the default module; 128 keeps it small & lane-aligned)
TED  = 128        # time_embed_dim (module default)
NB   = 2          # num_res_blocks (6 in the default module; 2 for the small demo)
G    = 32         # GroupNorm groups
CPG  = H // G     # channels per group
EPS  = 1e-5       # PyTorch GroupNorm default eps
DT, T0 = 0.01, 0.0
INV_SQRT2 = 1.0 / math.sqrt(2.0)

GPAD    = 128     # group axis padded to one full lane width (extra lanes are zeroed out)
OUT_PAD = 128     # lane-dense output width; wrapper slices [:, :DOUT]
assert H % G == 0 and H == 128 and OUT_PAD == H  # ob3 row fits in the [NV,1,H] vector slab

# ---- packed-slab index constants ----
NW      = 3 * NB + 4              # square H x H weights: tw2, res_w*, ow1, ow2, ow3_pad
WI_TW2  = 0
WI_RES  = 1                       # + blk*3 + lyr
WI_OW1  = 1 + 3 * NB
WI_OW2  = WI_OW1 + 1
WI_OW3  = WI_OW1 + 2

NV       = 3 + 5 * NB + 5         # per-channel vectors (biases / gammas / betas)
VI_MAP_B = 0
VI_TB1   = 1
VI_TB2   = 2
VI_GN_G  = 3                      # NB entries
VI_GN_B  = 3 + NB                 # NB entries
VI_RES_B = 3 + 2 * NB             # 3*NB entries, + blk*3 + lyr
VI_FIN_G = 3 + 5 * NB
VI_FIN_B = VI_FIN_G + 1
VI_OB1   = VI_FIN_G + 2
VI_OB2   = VI_FIN_G + 3
VI_OB3   = VI_FIN_G + 4


def _silu(x):
    return x * jax.nn.sigmoid(x)


def timestep_embedding(t, dim):
    # matches the reference timestep_embedding (dim is even here)
    half = dim // 2
    freqs = jnp.exp(-math.log(10000.0) * jnp.arange(half, dtype=jnp.float32) / half)
    args = t[:, None].astype(jnp.float32) * freqs[None, :]
    return jnp.concatenate([jnp.cos(args), jnp.sin(args)], axis=-1)


def _round_up(n, m):
    return ((n + m - 1) // m) * m


# ----------------------------- Pallas kernel ---------------------------------
def resnet2_kernel(u_ref, temb_ref, gnm_ref, w_in_ref, w_sq_ref, vecs_ref, out_ref):
    f32, bf16 = jnp.float32, jnp.bfloat16

    def vec(i):                      # [1, H] f32 bias / gamma / beta row
        return vecs_ref[i]

    def lin_sq(a, wi, bi):           # H x H linear: bf16 MXU operands, f32 accumulate
        return jnp.dot(a.astype(bf16), w_sq_ref[wi],
                       preferred_element_type=f32) + vec(bi)

    def gn(h, gi, bi):
        # GroupNorm(32, H) with 2 MXU ops:
        #   stats = [h ; h*h] @ Mp            (1/CPG folded into Mp -> mean, E[x^2])
        #   bc    = [inv ; mean*inv] @ MTp    (broadcast [B,G] -> [B,H])
        # Kept in f32: the msq - mean^2 cancellation is too precision-sensitive for bf16.
        b = h.shape[0]
        stats = jnp.dot(jnp.concatenate([h, h * h], axis=0), gnm_ref[:H, :],
                        preferred_element_type=f32)                     # [2b, GPAD]
        mean, msq = stats[:b], stats[b:]
        inv = jax.lax.rsqrt(jnp.maximum(msq - mean * mean, 0.0) + EPS)  # [b, GPAD]
        bc = jnp.dot(jnp.concatenate([inv, mean * inv], axis=0), gnm_ref[H:, :],
                     preferred_element_type=f32)                        # [2b, H]
        return (h * bc[:b] - bc[b:]) * vec(gi) + vec(bi)

    # --- t_module: Linear -> SiLU -> Linear ---
    t1 = _silu(jnp.dot(temb_ref[...].astype(bf16), w_in_ref[:TED, :],
                       preferred_element_type=f32) + vec(VI_TB1))
    t_out = lin_sq(t1, WI_TW2, VI_TB2)

    # --- x_module (FCnet): map + residual blocks ---
    h = jnp.dot(u_ref[...].astype(bf16), w_in_ref[TED:, :],
                preferred_element_type=f32) + vec(VI_MAP_B)
    for blk in range(NB):                                   # static unroll (NB small)
        r = gn(h, VI_GN_G + blk, VI_GN_B + blk)
        for lyr in range(3):                                # 3x (Linear + SiLU)
            r = _silu(lin_sq(r, WI_RES + blk * 3 + lyr, VI_RES_B + blk * 3 + lyr))
        h = (h + r) * INV_SQRT2

    # --- head: GroupNorm(x_out + t_out) -> (Linear+SiLU) x2 -> Linear ---
    z = gn(h + t_out, VI_FIN_G, VI_FIN_B)
    z = _silu(lin_sq(z, WI_OW1, VI_OB1))
    z = _silu(lin_sq(z, WI_OW2, VI_OB2))
    out_ref[...] = lin_sq(z, WI_OW3, VI_OB3).astype(out_ref.dtype)   # lane-dense [tb, 128]


# ------------------------------- wrapper --------------------------------------
def resnet2_forward(x, v, t, packed):
    t = jnp.atleast_1d(t)
    tn = (t - T0) / DT
    u = jnp.concatenate([x, v], axis=-1).astype(jnp.float32)     # [B, DIN]
    temb = timestep_embedding(tn, TED)                           # [B, TED]

    b_in = u.shape[0]
    tb = min(128, _round_up(b_in, 8))      # batch tile: fills the MXU once batch grows
    b_pad = _round_up(b_in, tb)
    if b_pad != b_in:
        u = jnp.pad(u, ((0, b_pad - b_in), (0, 0)))
        temb = jnp.pad(temb, ((0, b_pad - b_in), (0, 0)))
    grid = (b_pad // tb,)

    resident = pl.BlockSpec(memory_space=pltpu.MemorySpace.VMEM)  # whole-array, VMEM resident

    lin_flops = 2 * b_pad * H * (H * (3 * NB + 4) + TED + DIN)
    gn_flops = 3 * 2 * 2 * (2 * b_pad) * H * GPAD
    cost = pl.CostEstimate(
        flops=int(lin_flops + gn_flops),
        transcendentals=int(b_pad * H * (3 * NB + 3) + 3 * b_pad * GPAD),
        bytes_accessed=int(sum(a.nbytes for a in packed.values())
                           + u.nbytes + temb.nbytes + b_pad * OUT_PAD * 4),
    )

    out = pl.pallas_call(
        resnet2_kernel,
        out_shape=jax.ShapeDtypeStruct((b_pad, OUT_PAD), jnp.float32),
        grid=grid,
        in_specs=[
            pl.BlockSpec((tb, DIN), lambda i: (i, 0)),     # u      (batch-tiled)
            pl.BlockSpec((tb, TED), lambda i: (i, 0)),     # temb   (batch-tiled)
            resident,                                      # gnm    [H+GPAD, H]  f32
            resident,                                      # w_in   [TED+DIN, H] bf16
            resident,                                      # w_sq   [NW, H, H]   bf16
            resident,                                      # vecs   [NV, 1, H]   f32
        ],
        out_specs=pl.BlockSpec((tb, OUT_PAD), lambda i: (i, 0)),
        compiler_params=pltpu.CompilerParams(dimension_semantics=("parallel",)),
        cost_estimate=cost,
    )(u, temb, packed['gnm'], packed['w_in'], packed['w_sq'], packed['vecs'])
    return out[:b_in, :DOUT]


# --------------------------- parameter construction ---------------------------
def init_params(key):
    ks = iter(jax.random.split(key, 64))

    def linear(din, dout):
        # PyTorch nn.Linear default init: U(-1/sqrt(fan_in), 1/sqrt(fan_in))
        lim = 1.0 / math.sqrt(din)
        w = jax.random.uniform(next(ks), (din, dout), jnp.float32, -lim, lim)
        b = jax.random.uniform(next(ks), (1, dout), jnp.float32, -lim, lim)
        return w, b

    p = {}
    p['map_w'], p['map_b'] = linear(DIN, H)
    rw, rb = [], []
    for _ in range(NB):
        ws, bs = [], []
        for _ in range(3):
            w, b = linear(H, H)
            ws.append(w); bs.append(b)
        rw.append(jnp.stack(ws)); rb.append(jnp.stack(bs))
    p['res_w'] = jnp.stack(rw)                              # [NB, 3, H, H]
    p['res_b'] = jnp.stack(rb)                              # [NB, 3, 1, H]
    p['gn_g'] = jnp.ones((NB, 1, H), jnp.float32)           # GroupNorm default affine
    p['gn_b'] = jnp.zeros((NB, 1, H), jnp.float32)
    p['tw1'], p['tb1'] = linear(TED, H)
    p['tw2'], p['tb2'] = linear(H, H)
    p['fin_g'] = jnp.ones((1, H), jnp.float32)
    p['fin_b'] = jnp.zeros((1, H), jnp.float32)
    p['ow1'], p['ob1'] = linear(H, H)
    p['ow2'], p['ob2'] = linear(H, H)
    p['ow3'], p['ob3'] = linear(H, DOUT)
    return p


def pack_params(p):
    """Pack the natural param dict into the 4 kernel slabs (bf16 weights, f32 vectors)."""
    bf16 = jnp.bfloat16

    # --- square H x H weights (bf16) ---
    sq = [p['tw2']]
    for blk in range(NB):
        for lyr in range(3):
            sq.append(p['res_w'][blk, lyr])
    sq += [p['ow1'], p['ow2']]
    ow3_pad = jnp.zeros((H, OUT_PAD), jnp.float32).at[:, :DOUT].set(p['ow3'])
    sq.append(ow3_pad)
    w_sq = jnp.stack(sq).astype(bf16)                              # [NW, H, H]

    # --- input-projection weights (bf16): [tw1 ; map_w] ---
    w_in = jnp.concatenate([p['tw1'], p['map_w']], axis=0).astype(bf16)   # [TED+DIN, H]

    # --- per-channel vectors (f32) ---
    vecs = [p['map_b'].reshape(H), p['tb1'].reshape(H), p['tb2'].reshape(H)]
    for blk in range(NB):
        vecs.append(p['gn_g'][blk].reshape(H))
    for blk in range(NB):
        vecs.append(p['gn_b'][blk].reshape(H))
    for blk in range(NB):
        for lyr in range(3):
            vecs.append(p['res_b'][blk, lyr].reshape(H))
    vecs += [p['fin_g'].reshape(H), p['fin_b'].reshape(H),
             p['ob1'].reshape(H), p['ob2'].reshape(H)]
    ob3_pad = jnp.zeros((OUT_PAD,), jnp.float32).at[:DOUT].set(p['ob3'].reshape(DOUT))
    vecs.append(ob3_pad)
    vecs_slab = jnp.stack(vecs).astype(jnp.float32)[:, None, :]    # [NV, 1, H]
    assert vecs_slab.shape[0] == NV and w_sq.shape[0] == NW

    # --- GroupNorm one-hot matrices (f32), 1/CPG folded in, padded to 128 lanes/rows ---
    gid = jnp.arange(H) // CPG
    mp  = jnp.zeros((H, GPAD), jnp.float32).at[jnp.arange(H), gid].set(1.0 / CPG)  # [H, GPAD]
    mtp = jnp.zeros((GPAD, H), jnp.float32).at[gid, jnp.arange(H)].set(1.0)        # [GPAD, H]
    gnm = jnp.concatenate([mp, mtp], axis=0)                        # [H+GPAD, H]

    return dict(w_sq=w_sq, w_in=w_in, vecs=vecs_slab, gnm=gnm)


# ----------------------------- pure-JAX reference -----------------------------
def resnet2_ref(x, v, t, params):
    def silu(a): return a * jax.nn.sigmoid(a)

    def gn(h, g, b):
        hr = h.reshape(h.shape[0], G, CPG)
        mean = hr.mean(-1, keepdims=True)
        var = hr.var(-1, keepdims=True)
        hn = ((hr - mean) / jnp.sqrt(var + EPS)).reshape(h.shape)
        return hn * g + b

    t = jnp.atleast_1d(t)
    tn = (t - T0) / DT
    u = jnp.concatenate([x, v], -1)
    temb = timestep_embedding(tn, TED)
    t1 = silu(temb @ params['tw1'] + params['tb1'])
    t_out = t1 @ params['tw2'] + params['tb2']
    h = u @ params['map_w'] + params['map_b']
    for blk in range(NB):
        r = gn(h, params['gn_g'][blk], params['gn_b'][blk])
        for lyr in range(3):
            r = silu(r @ params['res_w'][blk, lyr] + params['res_b'][blk, lyr])
        h = (h + r) * INV_SQRT2
    z = gn(h + t_out, params['fin_g'], params['fin_b'])
    z = silu(z @ params['ow1'] + params['ob1'])
    z = silu(z @ params['ow2'] + params['ob2'])
    return z @ params['ow3'] + params['ob3']


if __name__ == "__main__":
    key = jax.random.PRNGKey(0)
    kx, kv, kt, kp = jax.random.split(key, 4)
    x = jax.random.normal(kx, (B, DX), jnp.float32)
    v = jax.random.normal(kv, (B, DV), jnp.float32)
    t = jax.random.uniform(kt, (B,), jnp.float32)
    params = init_params(kp)
    packed = pack_params(params)

    out = jax.block_until_ready(resnet2_forward(x, v, t, packed))
    ref = jax.block_until_ready(resnet2_ref(x, v, t, params))

    assert out.shape == (B, DOUT), out.shape
    assert bool(jnp.all(jnp.isfinite(out)))
    # bf16 MXU operands vs the pure-f32 reference -> slightly looser tolerance.
    np.testing.assert_allclose(np.asarray(out), np.asarray(ref), rtol=5e-2, atol=5e-2)
    print("KERNEL_OK")
</pallas_src>

<mosaic_0001>
module attributes {stable_mosaic.version = 11 : i64} {
  func.func @resnet2_kernel(%arg0: i32, %arg1: memref<8x8xf32, #tpu.memory_space<vmem>>, %arg2: memref<8x128xf32, #tpu.memory_space<vmem>>, %arg3: memref<256x128xf32, #tpu.memory_space<vmem>>, %arg4: memref<136x128xbf16, #tpu.memory_space<vmem>>, %arg5: memref<10x128x128xbf16, #tpu.memory_space<vmem>>, %arg6: memref<18x1x128xf32, #tpu.memory_space<vmem>>, %arg7: memref<8x128xf32, #tpu.memory_space<vmem>>) attributes {dimension_semantics = [#tpu.dimension_semantics<parallel>], iteration_bounds = array<i64: 1>, scalar_prefetch = 0 : i64, scratch_operands = 0 : i64, tpu.core_type = #tpu.core_type<tc>, window_params = [{transform_indices = @transform_0, window_bounds = array<i64: 8, 8>}, {transform_indices = @transform_1, window_bounds = array<i64: 8, 128>}, {pipeline_mode = #tpu.pipeline_mode<synchronous>, transform_indices = @transform_2, window_bounds = array<i64: 256, 128>}, {pipeline_mode = #tpu.pipeline_mode<synchronous>, transform_indices = @transform_3, window_bounds = array<i64: 136, 128>}, {pipeline_mode = #tpu.pipeline_mode<synchronous>, transform_indices = @transform_4, window_bounds = array<i64: 10, 128, 128>}, {pipeline_mode = #tpu.pipeline_mode<synchronous>, transform_indices = @transform_5, window_bounds = array<i64: 18, 1, 128>}, {transform_indices = @transform_6, window_bounds = array<i64: 8, 128>}]} {
    %c0 = arith.constant 0 : index
    %c0_0 = arith.constant 0 : index
    %0 = vector.load %arg2[%c0, %c0_0] : memref<8x128xf32, #tpu.memory_space<vmem>>, vector<8x128xf32>
    %1 = arith.truncf %0 : vector<8x128xf32> to vector<8x128xbf16>
    %c0_1 = arith.constant 0 : index
    %c0_2 = arith.constant 0 : index
    %2 = vector.load %arg4[%c0_1, %c0_2] : memref<136x128xbf16, #tpu.memory_space<vmem>>, vector<128x128xbf16>
    %cst = arith.constant dense<0.000000e+00> : vector<8x128xf32>
    %3 = tpu.matmul %1, %2, %cst {dimension_numbers = #tpu.dot_dimension_numbers<[1], [0], [0], [1], [0, 0, 1, 1], [], []>} : vector<8x128xbf16>, vector<128x128xbf16>, vector<8x128xf32> -> vector<8x128xf32>
    %c1 = arith.constant 1 : index
    %c0_3 = arith.constant 0 : index
    %c0_4 = arith.constant 0 : index
    %4 = vector.load %arg6[%c1, %c0_3, %c0_4] : memref<18x1x128xf32, #tpu.memory_space<vmem>>, vector<1x1x128xf32>
    %5 = vector.shape_cast %4 : vector<1x1x128xf32> to vector<1x128xf32>
    %6 = vector.broadcast %5 : vector<1x128xf32> to vector<8x128xf32>
    %7 = arith.addf %3, %6 : vector<8x128xf32>
    %8 = arith.negf %7 : vector<8x128xf32>
    %9 = math.exp %8 : vector<8x128xf32>
    %cst_5 = arith.constant 1.000000e+00 : f32
    %10 = vector.broadcast %cst_5 : f32 to vector<8x128xf32>
    %11 = arith.addf %10, %9 : vector<8x128xf32>
    %12 = arith.divf %10, %11 : vector<8x128xf32>
    %13 = arith.mulf %7, %12 : vector<8x128xf32>
    %14 = arith.truncf %13 : vector<8x128xf32> to vector<8x128xbf16>
    %c0_6 = arith.constant 0 : index
    %c0_7 = arith.constant 0 : index
    %c0_8 = arith.constant 0 : index
    %15 = vector.load %arg5[%c0_6, %c0_7, %c0_8] : memref<10x128x128xbf16, #tpu.memory_space<vmem>>, vector<1x128x128xbf16>
    %16 = vector.shape_cast %15 : vector<1x128x128xbf16> to vector<128x128xbf16>
    %cst_9 = arith.constant dense<0.000000e+00> : vector<8x128xf32>
    %17 = tpu.matmul %14, %16, %cst_9 {dimension_numbers = #tpu.dot_dimension_numbers<[1], [0], [0], [1], [0, 0, 1, 1], [], []>} : vector<8x128xbf16>, vector<128x128xbf16>, vector<8x128xf32> -> vector<8x128xf32>
    %c2 = arith.constant 2 : index
    %c0_10 = arith.constant 0 : index
    %c0_11 = arith.constant 0 : index
    %18 = vector.load %arg6[%c2, %c0_10, %c0_11] : memref<18x1x128xf32, #tpu.memory_space<vmem>>, vector<1x1x128xf32>
    %19 = vector.shape_cast %18 : vector<1x1x128xf32> to vector<1x128xf32>
    %20 = vector.broadcast %19 : vector<1x128xf32> to vector<8x128xf32>
    %21 = arith.addf %17, %20 : vector<8x128xf32>
    %c0_12 = arith.constant 0 : index
    %c0_13 = arith.constant 0 : index
    %22 = vector.load %arg1[%c0_12, %c0_13] : memref<8x8xf32, #tpu.memory_space<vmem>>, vector<8x8xf32>
    %23 = arith.truncf %22 : vector<8x8xf32> to vector<8x8xbf16>
    %c128 = arith.constant 128 : index
    %c0_14 = arith.constant 0 : index
    %24 = vector.load %arg4[%c128, %c0_14] : memref<136x128xbf16, #tpu.memory_space<vmem>>, vector<8x128xbf16>
    %cst_15 = arith.constant dense<0.000000e+00> : vector<8x128xf32>
    %25 = tpu.matmul %23, %24, %cst_15 {dimension_numbers = #tpu.dot_dimension_numbers<[1], [0], [0], [1], [0, 0, 1, 1], [], []>} : vector<8x8xbf16>, vector<8x128xbf16>, vector<8x128xf32> -> vector<8x128xf32>
    %c0_16 = arith.constant 0 : index
    %c0_17 = arith.constant 0 : index
    %c0_18 = arith.constant 0 : index
    %26 = vector.load %arg6[%c0_16, %c0_17, %c0_18] : memref<18x1x128xf32, #tpu.memory_space<vmem>>, vector<1x1x128xf32>
    %27 = vector.shape_cast %26 : vector<1x1x128xf32> to vector<1x128xf32>
    %28 = vector.broadcast %27 : vector<1x128xf32> to vector<8x128xf32>
    %29 = arith.addf %25, %28 : vector<8x128xf32>
    %30 = arith.mulf %29, %29 : vector<8x128xf32>
    %31 = tpu.concatenate %29, %30 in 0 : vector<8x128xf32>, vector<8x128xf32> -> vector<16x128xf32>
    %c0_19 = arith.constant 0 : index
    %c0_20 = arith.constant 0 : index
    %32 = vector.load %arg3[%c0_19, %c0_20] : memref<256x128xf32, #tpu.memory_space<vmem>>, vector<128x128xf32>
    %cst_21 = arith.constant dense<0.000000e+00> : vector<16x128xf32>
    %33 = tpu.matmul %31, %32, %cst_21 {dimension_numbers = #tpu.dot_dimension_numbers<[1], [0], [0], [1], [0, 0, 1, 1], [], []>} : vector<16x128xf32>, vector<128x128xf32>, vector<16x128xf32> -> vector<16x128xf32>
    %34 = vector.extract_strided_slice %33 {offsets = [0, 0], sizes = [8, 128], strides = [1, 1]} : vector<16x128xf32> to vector<8x128xf32>
    %35 = vector.extract_strided_slice %33 {offsets = [8, 0], sizes = [8, 128], strides = [1, 1]} : vector<16x128xf32> to vector<8x128xf32>
    %36 = arith.mulf %34, %34 : vector<8x128xf32>
    %37 = arith.subf %35, %36 : vector<8x128xf32>
    %cst_22 = arith.constant 0.000000e+00 : f32
    %38 = vector.broadcast %cst_22 : f32 to vector<8x128xf32>
    %39 = arith.maximumf %37, %38 : vector<8x128xf32>
    %cst_23 = arith.constant 9.99999974E-6 : f32
    %40 = vector.broadcast %cst_23 : f32 to vector<8x128xf32>
    %41 = arith.addf %39, %40 : vector<8x128xf32>
    %42 = math.rsqrt %41 : vector<8x128xf32>
    %43 = arith.mulf %34, %42 : vector<8x128xf32>
    %44 = tpu.concatenate %42, %43 in 0 : vector<8x128xf32>, vector<8x128xf32> -> vector<16x128xf32>
    %c128_24 = arith.constant 128 : index
    %c0_25 = arith.constant 0 : index
    %45 = vector.load %arg3[%c128_24, %c0_25] : memref<256x128xf32, #tpu.memory_space<vmem>>, vector<128x128xf32>
    %cst_26 = arith.constant dense<0.000000e+00> : vector<16x128xf32>
    %46 = tpu.matmul %44, %45, %cst_26 {dimension_numbers = #tpu.dot_dimension_numbers<[1], [0], [0], [1], [0, 0, 1, 1], [], []>} : vector<16x128xf32>, vector<128x128xf32>, vector<16x128xf32> -> vector<16x128xf32>
    %47 = vector.extract_strided_slice %46 {offsets = [0, 0], sizes = [8, 128], strides = [1, 1]} : vector<16x128xf32> to vector<8x128xf32>
    %48 = arith.mulf %29, %47 : vector<8x128xf32>
    %49 = vector.extract_strided_slice %46 {offsets = [8, 0], sizes = [8, 128], strides = [1, 1]} : vector<16x128xf32> to vector<8x128xf32>
    %50 = arith.subf %48, %49 : vector<8x128xf32>
    %c3 = arith.constant 3 : index
    %c0_27 = arith.constant 0 : index
    %c0_28 = arith.constant 0 : index
    %51 = vector.load %arg6[%c3, %c0_27, %c0_28] : memref<18x1x128xf32, #tpu.memory_space<vmem>>, vector<1x1x128xf32>
    %52 = vector.shape_cast %51 : vector<1x1x128xf32> to vector<1x128xf32>
    %53 = vector.broadcast %52 : vector<1x128xf32> to vector<8x128xf32>
    %54 = arith.mulf %50, %53 : vector<8x128xf32>
    %c5 = arith.constant 5 : index
    %c0_29 = arith.constant 0 : index
    %c0_30 = arith.constant 0 : index
    %55 = vector.load %arg6[%c5, %c0_29, %c0_30] : memref<18x1x128xf32, #tpu.memory_space<vmem>>, vector<1x1x128xf32>
    %56 = vector.shape_cast %55 : vector<1x1x128xf32> to vector<1x128xf32>
    %57 = vector.broadcast %56 : vector<1x128xf32> to vector<8x128xf32>
    %58 = arith.addf %54, %57 : vector<8x128xf32>
    %59 = arith.truncf %58 : vector<8x128xf32> to vector<8x128xbf16>
    %c1_31 = arith.constant 1 : index
    %c0_32 = arith.constant 0 : index
    %c0_33 = arith.constant 0 : index
    %60 = vector.load %arg5[%c1_31, %c0_32, %c0_33] : memref<10x128x128xbf16, #tpu.memory_space<vmem>>, vector<1x128x128xbf16>
    %61 = vector.shape_cast %60 : vector<1x128x128xbf16> to vector<128x128xbf16>
    %cst_34 = arith.constant dense<0.000000e+00> : vector<8x128xf32>
    %62 = tpu.matmul %59, %61, %cst_34 {dimension_numbers = #tpu.dot_dimension_numbers<[1], [0], [0], [1], [0, 0, 1, 1], [], []>} : vector<8x128xbf16>, vector<128x128xbf16>, vector<8x128xf32> -> vector<8x128xf32>
    %c7 = arith.constant 7 : index
    %c0_35 = arith.constant 0 : index
    %c0_36 = arith.constant 0 : index
    %63 = vector.load %arg6[%c7, %c0_35, %c0_36] : memref<18x1x128xf32, #tpu.memory_space<vmem>>, vector<1x1x128xf32>
    %64 = vector.shape_cast %63 : vector<1x1x128xf32> to vector<1x128xf32>
    %65 = vector.broadcast %64 : vector<1x128xf32> to vector<8x128xf32>
    %66 = arith.addf %62, %65 : vector<8x128xf32>
    %67 = arith.negf %66 : vector<8x128xf32>
    %68 = math.exp %67 : vector<8x128xf32>
    %cst_37 = arith.constant 1.000000e+00 : f32
    %69 = vector.broadcast %cst_37 : f32 to vector<8x128xf32>
    %70 = arith.addf %69, %68 : vector<8x128xf32>
    %71 = arith.divf %69, %70 : vector<8x128xf32>
    %72 = arith.mulf %66, %71 : vector<8x128xf32>
    %73 = arith.truncf %72 : vector<8x128xf32> to vector<8x128xbf16>
    %c2_38 = arith.constant 2 : index
    %c0_39 = arith.constant 0 : index
    %c0_40 = arith.constant 0 : index
    %74 = vector.load %arg5[%c2_38, %c0_39, %c0_40] : memref<10x128x128xbf16, #tpu.memory_space<vmem>>, vector<1x128x128xbf16>
    %75 = vector.shape_cast %74 : vector<1x128x128xbf16> to vector<128x128xbf16>
    %cst_41 = arith.constant dense<0.000000e+00> : vector<8x128xf32>
    %76 = tpu.matmul %73, %75, %cst_41 {dimension_numbers = #tpu.dot_dimension_numbers<[1], [0], [0], [1], [0, 0, 1, 1], [], []>} : vector<8x128xbf16>, vector<128x128xbf16>, vector<8x128xf32> -> vector<8x128xf32>
    %c8 = arith.constant 8 : index
    %c0_42 = arith.constant 0 : index
    %c0_43 = arith.constant 0 : index
    %77 = vector.load %arg6[%c8, %c0_42, %c0_43] : memref<18x1x128xf32, #tpu.memory_space<vmem>>, vector<1x1x128xf32>
    %78 = vector.shape_cast %77 : vector<1x1x128xf32> to vector<1x128xf32>
    %79 = vector.broadcast %78 : vector<1x128xf32> to vector<8x128xf32>
    %80 = arith.addf %76, %79 : vector<8x128xf32>
    %81 = arith.negf %80 : vector<8x128xf32>
    %82 = math.exp %81 : vector<8x128xf32>
    %cst_44 = arith.constant 1.000000e+00 : f32
    %83 = vector.broadcast %cst_44 : f32 to vector<8x128xf32>
    %84 = arith.addf %83, %82 : vector<8x128xf32>
    %85 = arith.divf %83, %84 : vector<8x128xf32>
    %86 = arith.mulf %80, %85 : vector<8x128xf32>
    %87 = arith.truncf %86 : vector<8x128xf32> to vector<8x128xbf16>
    %c3_45 = arith.constant 3 : index
    %c0_46 = arith.constant 0 : index
    %c0_47 = arith.constant 0 : index
    %88 = vector.load %arg5[%c3_45, %c0_46, %c0_47] : memref<10x128x128xbf16, #tpu.memory_space<vmem>>, vector<1x128x128xbf16>
    %89 = vector.shape_cast %88 : vector<1x128x128xbf16> to vector<128x128xbf16>
    %cst_48 = arith.constant dense<0.000000e+00> : vector<8x128xf32>
    %90 = tpu.matmul %87, %89, %cst_48 {dimension_numbers = #tpu.dot_dimension_numbers<[1], [0], [0], [1], [0, 0, 1, 1], [], []>} : vector<8x128xbf16>, vector<128x128xbf16>, vector<8x128xf32> -> vector<8x128xf32>
    %c9 = arith.constant 9 : index
    %c0_49 = arith.constant 0 : index
    %c0_50 = arith.constant 0 : index
    %91 = vector.load %arg6[%c9, %c0_49, %c0_50] : memref<18x1x128xf32, #tpu.memory_space<vmem>>, vector<1x1x128xf32>
    %92 = vector.shape_cast %91 : vector<1x1x128xf32> to vector<1x128xf32>
    %93 = vector.broadcast %92 : vector<1x128xf32> to vector<8x128xf32>
    %94 = arith.addf %90, %93 : vector<8x128xf32>
    %95 = arith.negf %94 : vector<8x128xf32>
    %96 = math.exp %95 : vector<8x128xf32>
    %cst_51 = arith.constant 1.000000e+00 : f32
    %97 = vector.broadcast %cst_51 : f32 to vector<8x128xf32>
    %98 = arith.addf %97, %96 : vector<8x128xf32>
    %99 = arith.divf %97, %98 : vector<8x128xf32>
    %100 = arith.mulf %94, %99 : vector<8x128xf32>
    %101 = arith.addf %29, %100 : vector<8x128xf32>
    %cst_52 = arith.constant 0.707106769 : f32
    %102 = vector.broadcast %cst_52 : f32 to vector<8x128xf32>
    %103 = arith.mulf %101, %102 : vector<8x128xf32>
    %104 = arith.mulf %103, %103 : vector<8x128xf32>
    %105 = tpu.concatenate %103, %104 in 0 : vector<8x128xf32>, vector<8x128xf32> -> vector<16x128xf32>
    %c0_53 = arith.constant 0 : index
    %c0_54 = arith.constant 0 : index
    %106 = vector.load %arg3[%c0_53, %c0_54] : memref<256x128xf32, #tpu.memory_space<vmem>>, vector<128x128xf32>
    %cst_55 = arith.constant dense<0.000000e+00> : vector<16x128xf32>
    %107 = tpu.matmul %105, %106, %cst_55 {dimension_numbers = #tpu.dot_dimension_numbers<[1], [0], [0], [1], [0, 0, 1, 1], [], []>} : vector<16x128xf32>, vector<128x128xf32>, vector<16x128xf32> -> vector<16x128xf32>
    %108 = vector.extract_strided_slice %107 {offsets = [0, 0], sizes = [8, 128], strides = [1, 1]} : vector<16x128xf32> to vector<8x128xf32>
    %109 = vector.extract_strided_slice %107 {offsets = [8, 0], sizes = [8, 128], strides = [1, 1]} : vector<16x128xf32> to vector<8x128xf32>
    %110 = arith.mulf %108, %108 : vector<8x128xf32>
    %111 = arith.subf %109, %110 : vector<8x128xf32>
    %cst_56 = arith.constant 0.000000e+00 : f32
    %112 = vector.broadcast %cst_56 : f32 to vector<8x128xf32>
    %113 = arith.maximumf %111, %112 : vector<8x128xf32>
    %cst_57 = arith.constant 9.99999974E-6 : f32
    %114 = vector.broadcast %cst_57 : f32 to vector<8x128xf32>
    %115 = arith.addf %113, %114 : vector<8x128xf32>
    %116 = math.rsqrt %115 : vector<8x128xf32>
    %117 = arith.mulf %108, %116 : vector<8x128xf32>
    %118 = tpu.concatenate %116, %117 in 0 : vector<8x128xf32>, vector<8x128xf32> -> vector<16x128xf32>
    %c128_58 = arith.constant 128 : index
    %c0_59 = arith.constant 0 : index
    %119 = vector.load %arg3[%c128_58, %c0_59] : memref<256x128xf32, #tpu.memory_space<vmem>>, vector<128x128xf32>
    %cst_60 = arith.constant dense<0.000000e+00> : vector<16x128xf32>
    %120 = tpu.matmul %118, %119, %cst_60 {dimension_numbers = #tpu.dot_dimension_numbers<[1], [0], [0], [1], [0, 0, 1, 1], [], []>} : vector<16x128xf32>, vector<128x128xf32>, vector<16x128xf32> -> vector<16x128xf32>
    %121 = vector.extract_strided_slice %120 {offsets = [0, 0], sizes = [8, 128], strides = [1, 1]} : vector<16x128xf32> to vector<8x128xf32>
    %122 = arith.mulf %103, %121 : vector<8x128xf32>
    %123 = vector.extract_strided_slice %120 {offsets = [8, 0], sizes = [8, 128], strides = [1, 1]} : vector<16x128xf32> to vector<8x128xf32>
    %124 = arith.subf %122, %123 : vector<8x128xf32>
    %c4 = arith.constant 4 : index
    %c0_61 = arith.constant 0 : index
    %c0_62 = arith.constant 0 : index
    %125 = vector.load %arg6[%c4, %c0_61, %c0_62] : memref<18x1x128xf32, #tpu.memory_space<vmem>>, vector<1x1x128xf32>
    %126 = vector.shape_cast %125 : vector<1x1x128xf32> to vector<1x128xf32>
    %127 = vector.broadcast %126 : vector<1x128xf32> to vector<8x128xf32>
    %128 = arith.mulf %124, %127 : vector<8x128xf32>
    %c6 = arith.constant 6 : index
    %c0_63 = arith.constant 0 : index
    %c0_64 = arith.constant 0 : index
    %129 = vector.load %arg6[%c6, %c0_63, %c0_64] : memref<18x1x128xf32, #tpu.memory_space<vmem>>, vector<1x1x128xf32>
    %130 = vector.shape_cast %129 : vector<1x1x128xf32> to vector<1x128xf32>
    %131 = vector.broadcast %130 : vector<1x128xf32> to vector<8x128xf32>
    %132 = arith.addf %128, %131 : vector<8x128xf32>
    %133 = arith.truncf %132 : vector<8x128xf32> to vector<8x128xbf16>
    %c4_65 = arith.constant 4 : index
    %c0_66 = arith.constant 0 : index
    %c0_67 = arith.constant 0 : index
    %134 = vector.load %arg5[%c4_65, %c0_66, %c0_67] : memref<10x128x128xbf16, #tpu.memory_space<vmem>>, vector<1x128x128xbf16>
    %135 = vector.shape_cast %134 : vector<1x128x128xbf16> to vector<128x128xbf16>
    %cst_68 = arith.constant dense<0.000000e+00> : vector<8x128xf32>
    %136 = tpu.matmul %133, %135, %cst_68 {dimension_numbers = #tpu.dot_dimension_numbers<[1], [0], [0], [1], [0, 0, 1, 1], [], []>} : vector<8x128xbf16>, vector<128x128xbf16>, vector<8x128xf32> -> vector<8x128xf32>
    %c10 = arith.constant 10 : index
    %c0_69 = arith.constant 0 : index
    %c0_70 = arith.constant 0 : index
    %137 = vector.load %arg6[%c10, %c0_69, %c0_70] : memref<18x1x128xf32, #tpu.memory_space<vmem>>, vector<1x1x128xf32>
    %138 = vector.shape_cast %137 : vector<1x1x128xf32> to vector<1x128xf32>
    %139 = vector.broadcast %138 : vector<1x128xf32> to vector<8x128xf32>
    %140 = arith.addf %136, %139 : vector<8x128xf32>
    %141 = arith.negf %140 : vector<8x128xf32>
    %142 = math.exp %141 : vector<8x128xf32>
    %cst_71 = arith.constant 1.000000e+00 : f32
    %143 = vector.broadcast %cst_71 : f32 to vector<8x128xf32>
    %144 = arith.addf %143, %142 : vector<8x128xf32>
    %145 = arith.divf %143, %144 : vector<8x128xf32>
    %146 = arith.mulf %140, %145 : vector<8x128xf32>
    %147 = arith.truncf %146 : vector<8x128xf32> to vector<8x128xbf16>
    %c5_72 = arith.constant 5 : index
    %c0_73 = arith.constant 0 : index
    %c0_74 = arith.constant 0 : index
    %148 = vector.load %arg5[%c5_72, %c0_73, %c0_74] : memref<10x128x128xbf16, #tpu.memory_space<vmem>>, vector<1x128x128xbf16>
    %149 = vector.shape_cast %148 : vector<1x128x128xbf16> to vector<128x128xbf16>
    %cst_75 = arith.constant dense<0.000000e+00> : vector<8x128xf32>
    %150 = tpu.matmul %147, %149, %cst_75 {dimension_numbers = #tpu.dot_dimension_numbers<[1], [0], [0], [1], [0, 0, 1, 1], [], []>} : vector<8x128xbf16>, vector<128x128xbf16>, vector<8x128xf32> -> vector<8x128xf32>
    %c11 = arith.constant 11 : index
    %c0_76 = arith.constant 0 : index
    %c0_77 = arith.constant 0 : index
    %151 = vector.load %arg6[%c11, %c0_76, %c0_77] : memref<18x1x128xf32, #tpu.memory_space<vmem>>, vector<1x1x128xf32>
    %152 = vector.shape_cast %151 : vector<1x1x128xf32> to vector<1x128xf32>
    %153 = vector.broadcast %152 : vector<1x128xf32> to vector<8x128xf32>
    %154 = arith.addf %150, %153 : vector<8x128xf32>
    %155 = arith.negf %154 : vector<8x128xf32>
    %156 = math.exp %155 : vector<8x128xf32>
    %cst_78 = arith.constant 1.000000e+00 : f32
    %157 = vector.broadcast %cst_78 : f32 to vector<8x128xf32>
    %158 = arith.addf %157, %156 : vector<8x128xf32>
    %159 = arith.divf %157, %158 : vector<8x128xf32>
    %160 = arith.mulf %154, %159 : vector<8x128xf32>
    %161 = arith.truncf %160 : vector<8x128xf32> to vector<8x128xbf16>
    %c6_79 = arith.constant 6 : index
    %c0_80 = arith.constant 0 : index
    %c0_81 = arith.constant 0 : index
    %162 = vector.load %arg5[%c6_79, %c0_80, %c0_81] : memref<10x128x128xbf16, #tpu.memory_space<vmem>>, vector<1x128x128xbf16>
    %163 = vector.shape_cast %162 : vector<1x128x128xbf16> to vector<128x128xbf16>
    %cst_82 = arith.constant dense<0.000000e+00> : vector<8x128xf32>
    %164 = tpu.matmul %161, %163, %cst_82 {dimension_numbers = #tpu.dot_dimension_numbers<[1], [0], [0], [1], [0, 0, 1, 1], [], []>} : vector<8x128xbf16>, vector<128x128xbf16>, vector<8x128xf32> -> vector<8x128xf32>
    %c12 = arith.constant 12 : index
    %c0_83 = arith.constant 0 : index
    %c0_84 = arith.constant 0 : index
    %165 = vector.load %arg6[%c12, %c0_83, %c0_84] : memref<18x1x128xf32, #tpu.memory_space<vmem>>, vector<1x1x128xf32>
    %166 = vector.shape_cast %165 : vector<1x1x128xf32> to vector<1x128xf32>
    %167 = vector.broadcast %166 : vector<1x128xf32> to vector<8x128xf32>
    %168 = arith.addf %164, %167 : vector<8x128xf32>
    %169 = arith.negf %168 : vector<8x128xf32>
    %170 = math.exp %169 : vector<8x128xf32>
    %cst_85 = arith.constant 1.000000e+00 : f32
    %171 = vector.broadcast %cst_85 : f32 to vector<8x128xf32>
    %172 = arith.addf %171, %170 : vector<8x128xf32>
    %173 = arith.divf %171, %172 : vector<8x128xf32>
    %174 = arith.mulf %168, %173 : vector<8x128xf32>
    %175 = arith.addf %103, %174 : vector<8x128xf32>
    %cst_86 = arith.constant 0.707106769 : f32
    %176 = vector.broadcast %cst_86 : f32 to vector<8x128xf32>
    %177 = arith.mulf %175, %176 : vector<8x128xf32>
    %178 = arith.addf %177, %21 : vector<8x128xf32>
    %179 = arith.mulf %178, %178 : vector<8x128xf32>
    %180 = tpu.concatenate %178, %179 in 0 : vector<8x128xf32>, vector<8x128xf32> -> vector<16x128xf32>
    %c0_87 = arith.constant 0 : index
    %c0_88 = arith.constant 0 : index
    %181 = vector.load %arg3[%c0_87, %c0_88] : memref<256x128xf32, #tpu.memory_space<vmem>>, vector<128x128xf32>
    %cst_89 = arith.constant dense<0.000000e+00> : vector<16x128xf32>
    %182 = tpu.matmul %180, %181, %cst_89 {dimension_numbers = #tpu.dot_dimension_numbers<[1], [0], [0], [1], [0, 0, 1, 1], [], []>} : vector<16x128xf32>, vector<128x128xf32>, vector<16x128xf32> -> vector<16x128xf32>
    %183 = vector.extract_strided_slice %182 {offsets = [0, 0], sizes = [8, 128], strides = [1, 1]} : vector<16x128xf32> to vector<8x128xf32>
    %184 = vector.extract_strided_slice %182 {offsets = [8, 0], sizes = [8, 128], strides = [1, 1]} : vector<16x128xf32> to vector<8x128xf32>
    %185 = arith.mulf %183, %183 : vector<8x128xf32>
    %186 = arith.subf %184, %185 : vector<8x128xf32>
    %cst_90 = arith.constant 0.000000e+00 : f32
    %187 = vector.broadcast %cst_90 : f32 to vector<8x128xf32>
    %188 = arith.maximumf %186, %187 : vector<8x128xf32>
    %cst_91 = arith.constant 9.99999974E-6 : f32
    %189 = vector.broadcast %cst_91 : f32 to vector<8x128xf32>
    %190 = arith.addf %188, %189 : vector<8x128xf32>
    %191 = math.rsqrt %190 : vector<8x128xf32>
    %192 = arith.mulf %183, %191 : vector<8x128xf32>
    %193 = tpu.concatenate %191, %192 in 0 : vector<8x128xf32>, vector<8x128xf32> -> vector<16x128xf32>
    %c128_92 = arith.constant 128 : index
    %c0_93 = arith.constant 0 : index
    %194 = vector.load %arg3[%c128_92, %c0_93] : memref<256x128xf32, #tpu.memory_space<vmem>>, vector<128x128xf32>
    %cst_94 = arith.constant dense<0.000000e+00> : vector<16x128xf32>
    %195 = tpu.matmul %193, %194, %cst_94 {dimension_numbers = #tpu.dot_dimension_numbers<[1], [0], [0], [1], [0, 0, 1, 1], [], []>} : vector<16x128xf32>, vector<128x128xf32>, vector<16x128xf32> -> vector<16x128xf32>
    %196 = vector.extract_strided_slice %195 {offsets = [0, 0], sizes = [8, 128], strides = [1, 1]} : vector<16x128xf32> to vector<8x128xf32>
    %197 = arith.mulf %178, %196 : vector<8x128xf32>
    %198 = vector.extract_strided_slice %195 {offsets = [8, 0], sizes = [8, 128], strides = [1, 1]} : vector<16x128xf32> to vector<8x128xf32>
    %199 = arith.subf %197, %198 : vector<8x128xf32>
    %c13 = arith.constant 13 : index
    %c0_95 = arith.constant 0 : index
    %c0_96 = arith.constant 0 : index
    %200 = vector.load %arg6[%c13, %c0_95, %c0_96] : memref<18x1x128xf32, #tpu.memory_space<vmem>>, vector<1x1x128xf32>
    %201 = vector.shape_cast %200 : vector<1x1x128xf32> to vector<1x128xf32>
    %202 = vector.broadcast %201 : vector<1x128xf32> to vector<8x128xf32>
    %203 = arith.mulf %199, %202 : vector<8x128xf32>
    %c14 = arith.constant 14 : index
    %c0_97 = arith.constant 0 : index
    %c0_98 = arith.constant 0 : index
    %204 = vector.load %arg6[%c14, %c0_97, %c0_98] : memref<18x1x128xf32, #tpu.memory_space<vmem>>, vector<1x1x128xf32>
    %205 = vector.shape_cast %204 : vector<1x1x128xf32> to vector<1x128xf32>
    %206 = vector.broadcast %205 : vector<1x128xf32> to vector<8x128xf32>
    %207 = arith.addf %203, %206 : vector<8x128xf32>
    %208 = arith.truncf %207 : vector<8x128xf32> to vector<8x128xbf16>
    %c7_99 = arith.constant 7 : index
    %c0_100 = arith.constant 0 : index
    %c0_101 = arith.constant 0 : index
    %209 = vector.load %arg5[%c7_99, %c0_100, %c0_101] : memref<10x128x128xbf16, #tpu.memory_space<vmem>>, vector<1x128x128xbf16>
    %210 = vector.shape_cast %209 : vector<1x128x128xbf16> to vector<128x128xbf16>
    %cst_102 = arith.constant dense<0.000000e+00> : vector<8x128xf32>
    %211 = tpu.matmul %208, %210, %cst_102 {dimension_numbers = #tpu.dot_dimension_numbers<[1], [0], [0], [1], [0, 0, 1, 1], [], []>} : vector<8x128xbf16>, vector<128x128xbf16>, vector<8x128xf32> -> vector<8x128xf32>
    %c15 = arith.constant 15 : index
    %c0_103 = arith.constant 0 : index
    %c0_104 = arith.constant 0 : index
    %212 = vector.load %arg6[%c15, %c0_103, %c0_104] : memref<18x1x128xf32, #tpu.memory_space<vmem>>, vector<1x1x128xf32>
    %213 = vector.shape_cast %212 : vector<1x1x128xf32> to vector<1x128xf32>
    %214 = vector.broadcast %213 : vector<1x128xf32> to vector<8x128xf32>
    %215 = arith.addf %211, %214 : vector<8x128xf32>
    %216 = arith.negf %215 : vector<8x128xf32>
    %217 = math.exp %216 : vector<8x128xf32>
    %cst_105 = arith.constant 1.000000e+00 : f32
    %218 = vector.broadcast %cst_105 : f32 to vector<8x128xf32>
    %219 = arith.addf %218, %217 : vector<8x128xf32>
    %220 = arith.divf %218, %219 : vector<8x128xf32>
    %221 = arith.mulf %215, %220 : vector<8x128xf32>
    %222 = arith.truncf %221 : vector<8x128xf32> to vector<8x128xbf16>
    %c8_106 = arith.constant 8 : index
    %c0_107 = arith.constant 0 : index
    %c0_108 = arith.constant 0 : index
    %223 = vector.load %arg5[%c8_106, %c0_107, %c0_108] : memref<10x128x128xbf16, #tpu.memory_space<vmem>>, vector<1x128x128xbf16>
    %224 = vector.shape_cast %223 : vector<1x128x128xbf16> to vector<128x128xbf16>
    %cst_109 = arith.constant dense<0.000000e+00> : vector<8x128xf32>
    %225 = tpu.matmul %222, %224, %cst_109 {dimension_numbers = #tpu.dot_dimension_numbers<[1], [0], [0], [1], [0, 0, 1, 1], [], []>} : vector<8x128xbf16>, vector<128x128xbf16>, vector<8x128xf32> -> vector<8x128xf32>
    %c16 = arith.constant 16 : index
    %c0_110 = arith.constant 0 : index
    %c0_111 = arith.constant 0 : index
    %226 = vector.load %arg6[%c16, %c0_110, %c0_111] : memref<18x1x128xf32, #tpu.memory_space<vmem>>, vector<1x1x128xf32>
    %227 = vector.shape_cast %226 : vector<1x1x128xf32> to vector<1x128xf32>
    %228 = vector.broadcast %227 : vector<1x128xf32> to vector<8x128xf32>
    %229 = arith.addf %225, %228 : vector<8x128xf32>
    %230 = arith.negf %229 : vector<8x128xf32>
    %231 = math.exp %230 : vector<8x128xf32>
    %cst_112 = arith.constant 1.000000e+00 : f32
    %232 = vector.broadcast %cst_112 : f32 to vector<8x128xf32>
    %233 = arith.addf %232, %231 : vector<8x128xf32>
    %234 = arith.divf %232, %233 : vector<8x128xf32>
    %235 = arith.mulf %229, %234 : vector<8x128xf32>
    %236 = arith.truncf %235 : vector<8x128xf32> to vector<8x128xbf16>
    %c9_113 = arith.constant 9 : index
    %c0_114 = arith.constant 0 : index
    %c0_115 = arith.constant 0 : index
    %237 = vector.load %arg5[%c9_113, %c0_114, %c0_115] : memref<10x128x128xbf16, #tpu.memory_space<vmem>>, vector<1x128x128xbf16>
    %238 = vector.shape_cast %237 : vector<1x128x128xbf16> to vector<128x128xbf16>
    %cst_116 = arith.constant dense<0.000000e+00> : vector<8x128xf32>
    %239 = tpu.matmul %236, %238, %cst_116 {dimension_numbers = #tpu.dot_dimension_numbers<[1], [0], [0], [1], [0, 0, 1, 1], [], []>} : vector<8x128xbf16>, vector<128x128xbf16>, vector<8x128xf32> -> vector<8x128xf32>
    %c17 = arith.constant 17 : index
    %c0_117 = arith.constant 0 : index
    %c0_118 = arith.constant 0 : index
    %240 = vector.load %arg6[%c17, %c0_117, %c0_118] : memref<18x1x128xf32, #tpu.memory_space<vmem>>, vector<1x1x128xf32>
    %241 = vector.shape_cast %240 : vector<1x1x128xf32> to vector<1x128xf32>
    %242 = vector.broadcast %241 : vector<1x128xf32> to vector<8x128xf32>
    %243 = arith.addf %239, %242 : vector<8x128xf32>
    %c0_119 = arith.constant 0 : index
    %c0_120 = arith.constant 0 : index
    %244 = vector.load %arg7[%c0_119, %c0_120] : memref<8x128xf32, #tpu.memory_space<vmem>>, vector<8x128xf32>
    tpu.vector_store %arg7[%c0_119, %c0_120], %243 {strides = array<i32>} : memref<8x128xf32, #tpu.memory_space<vmem>>, vector<8x128xf32>,
    return
  }
  func.func @transform_0(%arg0: i32) -> (i32, i32) {
    %c0_i32 = arith.constant 0 : i32
    %c0_i32_0 = arith.constant 0 : i32
    return %arg0, %c0_i32 : i32, i32
  }
  func.func @transform_1(%arg0: i32) -> (i32, i32) {
    %c0_i32 = arith.constant 0 : i32
    %c0_i32_0 = arith.constant 0 : i32
    return %arg0, %c0_i32 : i32, i32
  }
  func.func @transform_2(%arg0: i32) -> (i32, i32) {
    %c0_i32 = arith.constant 0 : i32
    %c0_i32_0 = arith.constant 0 : i32
    %c0_i32_1 = arith.constant 0 : i32
    return %c0_i32, %c0_i32_0 : i32, i32
  }
  func.func @transform_3(%arg0: i32) -> (i32, i32) {
    %c0_i32 = arith.constant 0 : i32
    %c0_i32_0 = arith.constant 0 : i32
    %c0_i32_1 = arith.constant 0 : i32
    return %c0_i32, %c0_i32_0 : i32, i32
  }
  func.func @transform_4(%arg0: i32) -> (i32, i32, i32) {
    %c0_i32 = arith.constant 0 : i32
    %c0_i32_0 = arith.constant 0 : i32
    %c0_i32_1 = arith.constant 0 : i32
    %c0_i32_2 = arith.constant 0 : i32
    return %c0_i32, %c0_i32_0, %c0_i32_1 : i32, i32, i32
  }
  func.func @transform_5(%arg0: i32) -> (i32, i32, i32) {
    %c0_i32 = arith.constant 0 : i32
    %c0_i32_0 = arith.constant 0 : i32
    %c0_i32_1 = arith.constant 0 : i32
    %c0_i32_2 = arith.constant 0 : i32
    return %c0_i32, %c0_i32_0, %c0_i32_1 : i32, i32, i32
  }
  func.func @transform_6(%arg0: i32) -> (i32, i32) {
    %c0_i32 = arith.constant 0 : i32
    %c0_i32_0 = arith.constant 0 : i32
    return %arg0, %c0_i32 : i32, i32
  }
}

</mosaic_0001>

<bundles_post_ra>
// kernel: tpu_custom_call.1
= control target key start
LH: loop header
LB: loop body
LE: loop exit
PB: predicated region body
PF: predicated region fallthrough
CT: control target
= control target key end

     0   :  { %11 = vsyncpa [#allocation3], 0  ;;  %s3752_s0 = inlined_call_operand.hbm [shape: f32[8,8], index: 0, kind: input, shape index: {}]   ;;  %s3753_s1 = inlined_call_operand.hbm [shape: f32[8,128], index: 1, kind: input, shape index: {}]   ;;  %s3754_s2 = inlined_call_operand.hbm [shape: f32[256,128], index: 2, kind: input, shape index: {}]   ;;  %s3755_s3 = inlined_call_operand.hbm [shape: bf16[136,128], index: 3, kind: input, shape index: {}]   ;;  %s3756_s4 = inlined_call_operand.hbm [shape: bf16[10,128,128], index: 4, kind: input, shape index: {}]   ;;  %s3757_s5 = inlined_call_operand.vmem [shape: f32[18,1,128], index: 5, kind: input, shape index: {}]   ;;  %s3758_s6 = inlined_call_operand.hbm [shape: f32[8,128], index: 6, kind: output, shape index: {}]  }
   0x1   :  { %12 = vsyncpa [#allocation6], 0 }
   0x2   :  { %13 = vsyncpa [#allocation9], 0 }
   0x3   :  { %14 = vsyncpa [#allocation4], 0  ;;  %s3301_s21 = smov [#allocation5]   ;;  %s3302_s23 = smov [#allocation8]  }
   0x4   :  { %s31_s22 = sshll.u32 %s3301_s21, 4  ;;  %s52_s24 = sshll.u32 %s3302_s23, 4  ;;  %s32_s22 = int_to_ptr.vmem [resolvable:$true] %s31_s22  ;;  %s3348_s24 = int_to_ptr.vmem [resolvable:$true] %s52_s24 }
   0x5   :  { %s3161_s27 = scalar_lea.hbm %s3753_s1, 128 }
   0x6   :  { %p3162_p0 = scmp.ne.s32.totalorder %s3753_s1, %s3161_s27  ;;  %p3165_p1 = scmp.lt.u32.totalorder %s3161_s27, %s3753_s1 }
   0x8   :  { %p3167_p2 = pnand %p3165_p1, %p3162_p0 }
   0xa   :  { %3170 = shalt.err (!%p3167_p2)
}
   0xb   :  { %s3171_s8 = scalar_lea.vmem %s32_s22, 128  ;;  %p3176_p4 = scmp.lt.s32.totalorder %s32_s22, %s32_s22 }
   0xc   :  { %p3172_p3 = scmp.ne.s32.totalorder %s32_s22, %s3171_s8  ;;  %p3177_p5 = scmp.lt.s32.totalorder %s3171_s8, %s3171_s8 }
   0xe   :  { %p3178_p6 = por %p3177_p5, %p3176_p4 }
  0x10   :  { %p3179_p7 = pnand %p3178_p6, %p3172_p3 }
  0x12   :  { %3182 = shalt.err (!%p3179_p7)
}
  0x13   :  { %34 = dma.hbm_to_vmem [thread:$0]  %s3753_s1, 128, %s32_s22, [#allocation6]  }
  0x14   :  { %s3183_s13 = scalar_lea.hbm %s3755_s3, 1088 }
  0x15   :  { %p3184_p8 = scmp.ne.s32.totalorder %s3755_s3, %s3183_s13  ;;  %p3187_p9 = scmp.lt.u32.totalorder %s3183_s13, %s3755_s3 }
  0x17   :  { %p3189_p10 = pnand %p3187_p9, %p3184_p8 }
  0x19   :  { %3192 = shalt.err (!%p3189_p10)
}
  0x1a   :  { %s3193_s18 = scalar_lea.vmem %s3348_s24, 1088  ;;  %p3198_p12 = scmp.lt.s32.totalorder %s3348_s24, %s3348_s24 }
  0x1b   :  { %p3194_p11 = scmp.ne.s32.totalorder %s3348_s24, %s3193_s18  ;;  %p3199_p13 = scmp.lt.s32.totalorder %s3193_s18, %s3193_s18 }
  0x1d   :  { %p3200_p0 = por %p3199_p13, %p3198_p12 }
  0x1f   :  { %p3201_p1 = pnand %p3200_p0, %p3194_p11 }
  0x21   :  { %3204 = shalt.err (!%p3201_p1)
}
  0x22   :  { %s3303_s1 = smov 64   ;;  %s3304_s19 = smov 4  }
  0x23   :  { %58 = dma.hbm_to_vmem [thread:$0]  %s3755_s3, 1088, %s3348_s24, [#allocation9], %s3303_s1, %s3303_s1, %s3304_s19  }
  0x24   :  { %s3305_s22 = smov [#allocation2]   ;;  %s3306_s25 = smov [#allocation7]  }
  0x25   :  { %s21_s23 = sshll.u32 %s3305_s22, 4  ;;  %s40_s26 = sshll.u32 %s3306_s25, 4  ;;  %s22_s23 = int_to_ptr.vmem [resolvable:$true] %s21_s23  ;;  %s3382_s26 = int_to_ptr.vmem [resolvable:$true] %s40_s26 }
  0x26   :  { %s3205_s29 = scalar_lea.hbm %s3752_s0, 128 }
  0x27   :  { %p3206_p2 = scmp.ne.s32.totalorder %s3752_s0, %s3205_s29  ;;  %p3209_p3 = scmp.lt.u32.totalorder %s3205_s29, %s3752_s0 }
  0x29   :  { %p3211_p4 = pnand %p3209_p3, %p3206_p2 }
  0x2b   :  { %3214 = shalt.err (!%p3211_p4)
}
  0x2c   :  { %s3215_s3 = scalar_lea.vmem %s22_s23, 128  ;;  %p3220_p6 = scmp.lt.s32.totalorder %s22_s23, %s22_s23 }
  0x2d   :  { %p3216_p5 = scmp.ne.s32.totalorder %s22_s23, %s3215_s3  ;;  %p3221_p7 = scmp.lt.s32.totalorder %s3215_s3, %s3215_s3 }
  0x2f   :  { %p3222_p8 = por %p3221_p7, %p3220_p6 }
  0x31   :  { %p3223_p9 = pnand %p3222_p8, %p3216_p5 }
  0x33   :  { %3226 = shalt.err (!%p3223_p9)
}
  0x34   :  { %24 = dma.hbm_to_vmem [thread:$0]  %s3752_s0, 128, %s22_s23, [#allocation3]  }
  0x35   :  { %s3227_s13 = scalar_lea.hbm %s3754_s2, 4096 }
  0x36   :  { %p3228_p10 = scmp.ne.s32.totalorder %s3754_s2, %s3227_s13  ;;  %p3231_p11 = scmp.lt.u32.totalorder %s3227_s13, %s3754_s2 }
  0x38   :  { %p3233_p12 = pnand %p3231_p11, %p3228_p10 }
  0x3a   :  { %3236 = shalt.err (!%p3233_p12)
}
  0x3b   :  { %s3237_s18 = scalar_lea.vmem %s3382_s26, 4096  ;;  %p3242_p0 = scmp.lt.s32.totalorder %s3382_s26, %s3382_s26 }
  0x3c   :  { %p3238_p13 = scmp.ne.s32.totalorder %s3382_s26, %s3237_s18  ;;  %p3243_p1 = scmp.lt.s32.totalorder %s3237_s18, %s3237_s18 }
  0x3e   :  { %p3244_p2 = por %p3243_p1, %p3242_p0 }
  0x40   :  { %p3245_p3 = pnand %p3244_p2, %p3238_p13 }
  0x42   :  { %3248 = shalt.err (!%p3245_p3)
}
  0x43   :  { %s3307_s0 = smov 128   ;;  %s3308_s20 = smov 8  }
  0x44   :  { %46 = dma.hbm_to_vmem [thread:$0]  %s3754_s2, 4096, %s3382_s26, [#allocation6], %s3307_s0, %s3307_s0, %s3308_s20  }
  0x45   :  { %s3309_s23 = smov [#allocation10]   ;;  %s3249_s29 = scalar_lea.hbm %s3756_s4, 10240 }
  0x46   :  { %s64_s25 = sshll.u32 %s3309_s23, 4  ;;  %p3250_p4 = scmp.ne.s32.totalorder %s3756_s4, %s3249_s29  ;;  %s65_s25 = int_to_ptr.vmem [resolvable:$true] %s64_s25 }
  0x47   :  { %p3253_p5 = scmp.lt.u32.totalorder %s3249_s29, %s3756_s4 }
  0x49   :  { %p3255_p6 = pnand %p3253_p5, %p3250_p4 }
  0x4b   :  { %3258 = shalt.err (!%p3255_p6)
}
  0x4c   :  { %s3259_s3 = scalar_lea.vmem %s65_s25, 10240  ;;  %p3264_p8 = scmp.lt.s32.totalorder %s65_s25, %s65_s25 }
  0x4d   :  { %p3260_p7 = scmp.ne.s32.totalorder %s65_s25, %s3259_s3  ;;  %p3265_p9 = scmp.lt.s32.totalorder %s3259_s3, %s3259_s3 }
  0x4f   :  { %p3266_p10 = por %p3265_p9, %p3264_p8 }
  0x51   :  { %p3267_p11 = pnand %p3266_p10, %p3260_p7 }
  0x53   :  { %3270 = shalt.err (!%p3267_p11)
}
  0x54   :  { %70 = dma.hbm_to_vmem [thread:$0]  %s3756_s4, 10240, %s65_s25, [#allocation9], %s3303_s1, %s3303_s1, %s3304_s19  }
  0x55   :  { %3293 = dma.done.wait [#allocation3], 128  }
  0x56   :  { %3294 = vsyncadd [#allocation3], 4294967168 }
  0x57   :  { %3295 = dma.done.wait [#allocation6], 4224  }
  0x58   :  { %3296 = vsyncadd [#allocation6], 4294963072 }
  0x59   :  { %3297 = dma.done.wait [#allocation9], 11328  }
  0x5a   :  { %3298 = vsyncadd [#allocation9], 4294955968  ;;  %v3310_v0 = vmov 0.0   ;;  %vm3311_vm0 = vmmov 0   ;;  %v3031_v1 = vld [vmem:[#allocation8] sm:$0xff]   ;;  %v3032_v2 = vld [vmem:[#allocation8 + $0x8] sm:$0xff]  }
  0x5b   :  { %2391 = vmatprep.subr.bf16.mxu0 %v3310_v0  ;;  %2407 = vmatprep.mubr.msk.bf16.mxu0 %vm3311_vm0, %v3310_v0  ;;  %v3033_v3 = vld [vmem:[#allocation8 + $0x10] sm:$0xff]   ;;  %vm337_vm1 = vcmask 1043456   ;;  %v325_v4 = vld [vmem:[#allocation8 + $0x40] sm:$0xf]  ;;  %v3034_v5 = vld [vmem:[#allocation8 + $0x18] sm:$0xff]   ;;  %vm333_vm2 = vcmask 64512  }
  0x5c   :  { %2411 = vmatprep.subr.bf16.mxu1 %v3310_v0  ;;  %2427 = vmatprep.mubr.msk.bf16.mxu1 %vm3311_vm0, %v3310_v0  ;;  %v339_v6 = vsel %vm337_vm1, %v325_v4, 0  ;;  %v3035_v7 = vld [vmem:[#allocation8 + $0x20] sm:$0xff]   ;;  %v3036_v8 = vld [vmem:[#allocation8 + $0x28] sm:$0xff]   ;;  %v3037_v9 = vld [vmem:[#allocation8 + $0x30] sm:$0xff]   ;;  %s3312_s13 = smov [#allocation11]  }
  0x5d   :  { %2392 = vmatpush3.bf16.msra.mxu0 %v3031_v1  ;;  %v3038_v10 = vld [vmem:[#allocation8 + $0x38] sm:$0xff]   ;;  %v323_v13 = vld [vmem:[#allocation2] sm:$0xff]  ;;  %v3039_v15 = vld [vmem:[#allocation10] sm:$0xff]   ;;  %s2038_s14 = sshll.u32 %s3312_s13, 4  ;;  %s2039_s14 = int_to_ptr.vmem [resolvable:$true] %s2038_s14 }
  0x5e   :  { %2393 = vmatprep.subr.bf16.mxu0 %v3310_v0  ;;  %v89_v11 = vld [vmem:[#allocation5] sm:$0xff]  ;;  %v324_v14 = vpack.c.bf16 %v323_v13, %v323_v13  ;;  %2412 = vmatpush3.bf16.msra.mxu1 %v3039_v15  ;;  %v3040_v16 = vld [vmem:[#allocation10 + $0x8] sm:$0xff]   ;;  %v3043_v19 = vld [vmem:[#allocation10 + $0x20] sm:$0xff]   ;;  %s3271_s15 = scalar_lea.vmem %s2039_s14, 128  ;;  %p3276_p13 = scmp.lt.s32.totalorder %s2039_s14, %s2039_s14 }
  0x5f   :  { %v90_v12 = vpack.c.bf16 %v89_v11, %v89_v11  ;;  %2413 = vmatprep.subr.bf16.mxu1 %v3310_v0  ;;  %v3041_v17 = vld [vmem:[#allocation10 + $0x10] sm:$0xff]   ;;  %v3042_v18 = vld [vmem:[#allocation10 + $0x18] sm:$0xff]   ;;  %v3044_v20 = vld [vmem:[#allocation10 + $0x28] sm:$0xff]   ;;  %p3272_p12 = scmp.ne.s32.totalorder %s2039_s14, %s3271_s15  ;;  %p3277_p0 = scmp.lt.s32.totalorder %s3271_s15, %s3271_s15 }
  0x60   :  { %v3045_v21 = vld [vmem:[#allocation10 + $0x30] sm:$0xff]   ;;  %v3046_v22 = vld [vmem:[#allocation10 + $0x38] sm:$0xff]   ;;  %v383_v24 = vld [vmem:[#allocation7 + $0x8] sm:$0xff] }
  0x61   :  { %2394 = vmatpush3.bf16.msra.mxu0 %v3032_v2  ;;  %v382_v23 = vld [vmem:[#allocation7] sm:$0xff]  ;;  %v2050_v26 = vld [vmem:[%s3757_s5 + $0x1] ss:$0 sm:$0xff]  ;;  %v2070_v39 = vld [vmem:[%s3757_s5] ss:$0 sm:$0xff]  ;;  %p3278_p1 = por %p3277_p0, %p3276_p13 }
  0x62   :  { %2395 = vmatprep.subr.bf16.mxu0 %v3310_v0  ;;  %2414 = vmatpush3.bf16.msra.mxu1 %v3040_v16  ;;  %v3451_v25 = vpack.c.bf16 %v383_v24, %v382_v23  ;;  %v384_v41 = vld [vmem:[#allocation7 + $0x10] sm:$0xff]  ;;  %v385_v42 = vld [vmem:[#allocation7 + $0x18] sm:$0xff]  ;;  %v386_v47 = vld [vmem:[#allocation7 + $0x20] sm:$0xff] }
  0x63   :  { %2415 = vmatprep.subr.bf16.mxu1 %v3310_v0  ;;  %v3462_v46 = vpack.c.bf16 %v385_v42, %v384_v41  ;;  %v387_v48 = vld [vmem:[#allocation7 + $0x28] sm:$0xff]  ;;  %v388_v50 = vld [vmem:[#allocation7 + $0x30] sm:$0xff]  ;;  %v389_v51 = vld [vmem:[#allocation7 + $0x38] sm:$0xff]  ;;  %p3279_p2 = pnand %p3278_p1, %p3272_p12 }
  0x64   :  { %v3467_v49 = vpack.c.bf16 %v387_v48, %v386_v47  ;;  %v3471_v52 = vpack.c.bf16 %v389_v51, %v388_v50  ;;  %v390_v53 = vld [vmem:[#allocation7 + $0x40] sm:$0xff]  ;;  %v391_v54 = vld [vmem:[#allocation7 + $0x48] sm:$0xff]  ;;  %v392_v56 = vld [vmem:[#allocation7 + $0x50] sm:$0xff] }
  0x65   :  { %2396 = vmatpush3.bf16.msra.mxu0 %v3033_v3  ;;  %v3475_v55 = vpack.c.bf16 %v391_v54, %v390_v53  ;;  %v393_v57 = vld [vmem:[#allocation7 + $0x58] sm:$0xff]  ;;  %v394_v59 = vld [vmem:[#allocation7 + $0x60] sm:$0xff]  ;;  %v395_v60 = vld [vmem:[#allocation7 + $0x68] sm:$0xff] }
  0x66   :  { %2397 = vmatprep.subr.bf16.mxu0 %v3310_v0  ;;  %2416 = vmatpush3.bf16.msra.mxu1 %v3041_v17  ;;  %v3479_v58 = vpack.c.bf16 %v393_v57, %v392_v56  ;;  %v3483_v61 = vpack.c.bf16 %v395_v60, %v394_v59  ;;  %v396_v62 = vld [vmem:[#allocation7 + $0x70] sm:$0xff]  ;;  %v397_v63 = vld [vmem:[#allocation7 + $0x78] sm:$0xff]  ;;  %v479_v3 = vld [vmem:[#allocation7 + $0x80] sm:$0xff] }
  0x67   :  { %2417 = vmatprep.subr.bf16.mxu1 %v3310_v0  ;;  %v3487_v1 = vpack.c.bf16 %v397_v63, %v396_v62  ;;  %v480_v4 = vld [vmem:[#allocation7 + $0x88] sm:$0xff]  ;;  %v486_v13 = vld [vmem:[#allocation7 + $0xb8] sm:$0xff]  ;;  %v487_v15 = vld [vmem:[#allocation7 + $0xc0] sm:$0xff] }
  0x68   :  { %v488_v16 = vld [vmem:[#allocation7 + $0xc8] sm:$0xff]  ;;  %v493_v24 = vld [vmem:[#allocation7 + $0xf0] sm:$0xff]  ;;  %v3054_v50 = vld [vmem:[#allocation10 + $0x78] sm:$0xff]  }
  0x69   :  { %2398 = vmatpush3.bf16.msra.mxu0 %v3034_v5  ;;  %v481_v5 = vld [vmem:[#allocation7 + $0x90] sm:$0xff]  ;;  %v3513_v17 = vpack.c.bf16 %v488_v16, %v487_v15  ;;  %v2073_v56 = vld [vmem:[%s3757_s5 + $0x3] ss:$0 sm:$0xff]  ;;  %v2075_v59 = vld [vmem:[%s3757_s5 + $0x5] ss:$0 sm:$0xff] }
  0x6a   :  { %2399 = vmatprep.subr.bf16.mxu0 %v3310_v0  ;;  %2418 = vmatpush3.bf16.msra.mxu1 %v3042_v18  ;;  %v489_v18 = vld [vmem:[#allocation7 + $0xd0] sm:$0xff] }
  0x6b   :  { %2419 = vmatprep.subr.bf16.mxu1 %v3310_v0  ;;  %v3052_v47 = vld [vmem:[#allocation10 + $0x68] sm:$0xff]   ;;  %v3053_v48 = vld [vmem:[#allocation10 + $0x70] sm:$0xff]  }
  0x6d   :  { %2400 = vmatpush3.bf16.msra.mxu0 %v3035_v7  ;;  %v482_v7 = vld [vmem:[#allocation7 + $0x98] sm:$0xff] }
  0x6e   :  { %2401 = vmatprep.subr.bf16.mxu0 %v3310_v0  ;;  %2420 = vmatpush3.bf16.msra.mxu1 %v3043_v19  ;;  %v490_v19 = vld [vmem:[#allocation7 + $0xd8] sm:$0xff] }
  0x6f   :  { %2421 = vmatprep.subr.bf16.mxu1 %v3310_v0 }
  0x71   :  { %2402 = vmatpush3.bf16.msra.mxu0 %v3036_v8  ;;  %v3499_v8 = vpack.c.bf16 %v482_v7, %v481_v5  ;;  %v3058_v5 = vld [vmem:[#allocation10 + $0x98] sm:$0xff]   ;;  %v3059_v7 = vld [vmem:[#allocation10 + $0xa0] sm:$0xff]  }
  0x72   :  { %2403 = vmatprep.subr.bf16.mxu0 %v3310_v0  ;;  %2422 = vmatpush3.bf16.msra.mxu1 %v3044_v20  ;;  %v3517_v20 = vpack.c.bf16 %v490_v19, %v489_v18 }
  0x73   :  { %2423 = vmatprep.subr.bf16.mxu1 %v3310_v0 }
  0x75   :  { %2404 = vmatpush3.bf16.msra.mxu0 %v3037_v9  ;;  %v483_v9 = vld [vmem:[#allocation7 + $0xa0] sm:$0xff] }
  0x76   :  { %2405 = vmatprep.subr.bf16.mxu0 %v3310_v0  ;;  %2424 = vmatpush3.bf16.msra.mxu1 %v3045_v21  ;;  %v491_v21 = vld [vmem:[#allocation7 + $0xe0] sm:$0xff] }
  0x77   :  { %2425 = vmatprep.subr.bf16.mxu1 %v3310_v0 }
  0x79   :  { %2406 = vmatpush3.bf16.msra.mxu0 %v3038_v10  ;;  %v484_v10 = vld [vmem:[#allocation7 + $0xa8] sm:$0xff] }
  0x7a   :  { %2431 = vmatprep.subr.bf16.mxu0 %v3310_v0  ;;  %2426 = vmatpush3.bf16.msra.mxu1 %v3046_v22  ;;  %v3504_v11 = vpack.c.bf16 %v484_v10, %v483_v9  ;;  %v492_v22 = vld [vmem:[#allocation7 + $0xe8] sm:$0xff]  ;;  %v3061_v10 = vld [vmem:[#allocation10 + $0xb0] sm:$0xff]  }
  0x7b   :  { %2828 = vmatprep.subr.bf16.mxu1 %v3451_v25  ;;  %v3521_v23 = vpack.c.bf16 %v492_v22, %v491_v21  ;;  %v3060_v9 = vld [vmem:[#allocation10 + $0xa8] sm:$0xff]  }
  0x7c   :  { %2408 = vmatmul.mubr.bf16.vlgmr.msra.gmra.mrb[0].mxu0 %v90_v12  ;;  %v485_v12 = vld [vmem:[#allocation7 + $0xb0] sm:$0xff] }
  0x7d   :  { %2432 = vmatpush3.bf16.msra.mxu0 %v339_v6  ;;  %2433 = vmatprep.mubr.msk.bf16.mxu0 %vm3311_vm0, %v3310_v0  ;;  %v3497_v6 = vpack.c.bf16 %v480_v4, %v479_v3  ;;  %v3056_v3 = vld [vmem:[#allocation10 + $0x88] sm:$0xff]   ;;  %v3057_v4 = vld [vmem:[#allocation10 + $0x90] sm:$0xff]  }
  0x7f   :  { %2860 = vmatprep.subr.bf16.mxu0 %v3497_v6 }
  0x84   :  { %2434 = vmatmul.mubr.msk.bf16.vlgmr.msra.gmra.mrb[4].mxu0 %vm333_vm2, %v324_v14  ;;  %v3509_v14 = vpack.c.bf16 %v486_v13, %v485_v12  ;;  %v3062_v12 = vld [vmem:[#allocation10 + $0xb8] sm:$0xff]  }
  0x85   :  { %2862 = vmatpush3.bf16.msra.mxu0 %v3497_v6  ;;  %v2077_v13 = vld [vmem:[%s3757_s5 + $0x7] ss:$0 sm:$0xff] }
  0x86   :  { %2864 = vmatprep.subr.bf16.mxu0 %v3499_v8 }
  0x89   :  { %2866 = vmatpush3.bf16.msra.mxu0 %v3499_v8 }
  0x8a   :  { %2868 = vmatprep.subr.bf16.mxu0 %v3504_v11 }
  0x8d   :  { %2870 = vmatpush3.bf16.msra.mxu0 %v3504_v11 }
  0x8e   :  { %2872 = vmatprep.subr.bf16.mxu0 %v3509_v14 }
  0x91   :  { %2874 = vmatpush3.bf16.msra.mxu0 %v3509_v14 }
  0x92   :  { %2876 = vmatprep.subr.bf16.mxu0 %v3513_v17 }
  0x95   :  { %2878 = vmatpush3.bf16.msra.mxu0 %v3513_v17 }
  0x96   :  { %2880 = vmatprep.subr.bf16.mxu0 %v3517_v20 }
  0x99   :  { %2882 = vmatpush3.bf16.msra.mxu0 %v3517_v20 }
  0x9a   :  { %2884 = vmatprep.subr.bf16.mxu0 %v3521_v23 }
  0x9d   :  { %2886 = vmatpush3.bf16.msra.mxu0 %v3521_v23 }
 0x14f   :  { %v197_v27 = vpop.f32.mrb[0].mxu0 }
 0x150   :  { %v198_v28 = vadd.f32 %v2050_v26, %v197_v27  ;;  %v2409_v29 = vpop.f32.mrb[1].mxu0  ;;  %v494_v26 = vld [vmem:[#allocation7 + $0xf8] sm:$0xff] }
 0x151   :  { %v200_v30 = vpop.f32.mrb[2].mxu0  ;;  %v3525_v27 = vpack.c.bf16 %v494_v26, %v493_v24  ;;  %v3048_v29 = vld [vmem:[#allocation10 + $0x48] sm:$0xff]  }
 0x152   :  { %v2059_v31 = vmul.f32 -1.442695, %v198_v28  ;;  %v2410_v32 = vpop.f32.mrb[3].mxu0  ;;  %v3049_v30 = vld [vmem:[#allocation10 + $0x50] sm:$0xff]  }
 0x153   :  { %2888 = vmatprep.subr.bf16.mxu0 %v3525_v27  ;;  %v3051_v32 = vld [vmem:[#allocation10 + $0x60] sm:$0xff]  }
 0x154   :  { %3119 = vpow2.f32 %v2059_v31  ;;  %2890 = vmatpush3.bf16.msra.mxu0 %v3525_v27  ;;  %v3050_v31 = vld [vmem:[#allocation10 + $0x58] sm:$0xff]  }
 0x155   :  { %2527 = vmatprep.subr.bf16.mxu0 %v3310_v0 }
 0x157   :  { %v375_v33 = vpop.f32.mrb[4].mxu0 }
 0x158   :  { %v2435_v34 = vpop.f32.mrb[5].mxu0  ;;  %v3460_v44 = vadd.f32 %v2070_v39, %v375_v33 }
 0x159   :  { %v378_v35 = vpop.f32.mrb[6].mxu0 }
 0x15a   :  { %v2436_v36 = vpop.f32.mrb[7].mxu0  ;;  %v381_v2 = vmul.f32 %v3460_v44, %v3460_v44 }
 0x15e   :  { %v3120_v37 = vpop.eup %3119 }
 0x15f   :  { %v206_v38 = vadd.f32 1.0, %v3120_v37 }
 0x161   :  { %3121 = vrcp.f32 %v206_v38 }
 0x16b   :  { %v3122_v40 = vpop.eup %3121 }
 0x16c   :  { %v209_v43 = vmul.f32 %v3122_v40, %v198_v28  ;;  %v3047_v28 = vld [vmem:[#allocation10 + $0x40] sm:$0xff]  }
 0x16e   :  { %v210_v45 = vpack.c.bf16 %v209_v43, %v209_v43 }
 0x170   :  { %2428 = vmatmul.mubr.bf16.vlgmr.msra.gmra.mrb[0].mxu1 %v210_v45 }
 0x171   :  { %2830 = vmatpush3.bf16.msra.mxu1 %v3451_v25  ;;  %2469 = vmatprep.mubr.f32.mxu1 %v3460_v44 }
 0x172   :  { %2832 = vmatprep.subr.bf16.mxu1 %v3462_v46 }
 0x175   :  { %2834 = vmatpush3.bf16.msra.mxu1 %v3462_v46 }
 0x176   :  { %2836 = vmatprep.subr.bf16.mxu1 %v3467_v49 }
 0x179   :  { %2838 = vmatpush3.bf16.msra.mxu1 %v3467_v49 }
 0x17a   :  { %2840 = vmatprep.subr.bf16.mxu1 %v3471_v52 }
 0x17d   :  { %2842 = vmatpush3.bf16.msra.mxu1 %v3471_v52 }
 0x17e   :  { %2844 = vmatprep.subr.bf16.mxu1 %v3475_v55 }
 0x181   :  { %2846 = vmatpush3.bf16.msra.mxu1 %v3475_v55 }
 0x182   :  { %2848 = vmatprep.subr.bf16.mxu1 %v3479_v58 }
 0x185   :  { %2850 = vmatpush3.bf16.msra.mxu1 %v3479_v58 }
 0x186   :  { %2852 = vmatprep.subr.bf16.mxu1 %v3483_v61 }
 0x189   :  { %2854 = vmatpush3.bf16.msra.mxu1 %v3483_v61 }
 0x18a   :  { %2856 = vmatprep.subr.bf16.mxu1 %v3487_v1 }
 0x18d   :  { %2858 = vmatpush3.bf16.msra.mxu1 %v3487_v1 }
 0x18e   :  { %2507 = vmatprep.subr.bf16.mxu1 %v3310_v0 }
 0x190   :  { %2470 = vmatmul.mubr.f32.vlgmr.msra.gmra.mrb[4].mxu1 %v381_v2  ;;  %v3055_v2 = vld [vmem:[#allocation10 + $0x80] sm:$0xff]  }
 0x191   :  { %2523 = vmatprep.mubr.msk.bf16.mxu1 %vm3311_vm0, %v3310_v0  ;;  %2508 = vmatpush3.bf16.msra.mxu1 %v3047_v28 }
 0x192   :  { %2509 = vmatprep.subr.bf16.mxu1 %v3310_v0 }
 0x195   :  { %2510 = vmatpush3.bf16.msra.mxu1 %v3048_v29 }
 0x196   :  { %2511 = vmatprep.subr.bf16.mxu1 %v3310_v0 }
 0x199   :  { %2512 = vmatpush3.bf16.msra.mxu1 %v3049_v30 }
 0x19a   :  { %2513 = vmatprep.subr.bf16.mxu1 %v3310_v0 }
 0x19d   :  { %2514 = vmatpush3.bf16.msra.mxu1 %v3050_v31  ;;  %v3063_v31 = vld [vmem:[#allocation10 + $0xc0] sm:$0xff]  }
 0x19e   :  { %2515 = vmatprep.subr.bf16.mxu1 %v3310_v0 }
 0x1a1   :  { %2516 = vmatpush3.bf16.msra.mxu1 %v3051_v32  ;;  %v3064_v32 = vld [vmem:[#allocation10 + $0xc8] sm:$0xff]  }
 0x1a2   :  { %2517 = vmatprep.subr.bf16.mxu1 %v3310_v0 }
 0x1a5   :  { %2518 = vmatpush3.bf16.msra.mxu1 %v3052_v47 }
 0x1a6   :  { %2519 = vmatprep.subr.bf16.mxu1 %v3310_v0 }
 0x1a9   :  { %2520 = vmatpush3.bf16.msra.mxu1 %v3053_v48 }
 0x1aa   :  { %2521 = vmatprep.subr.bf16.mxu1 %v3310_v0 }
 0x1ad   :  { %2522 = vmatpush3.bf16.msra.mxu1 %v3054_v50 }
 0x1ae   :  { %2547 = vmatprep.subr.bf16.mxu1 %v3310_v0 }
 0x243   :  { %v3535_v33 = vpop.f32.mrb[0].mxu1 }
 0x244   :  { %v2429_v34 = vpop.f32.mrb[1].mxu1 }
 0x245   :  { %v320_v35 = vpop.f32.mrb[2].mxu1  ;;  %v3065_v34 = vld [vmem:[#allocation10 + $0xd0] sm:$0xff]  }
 0x246   :  { %v2430_v36 = vpop.f32.mrb[3].mxu1  ;;  %v3066_v35 = vld [vmem:[#allocation10 + $0xd8] sm:$0xff]  }
 0x247   :  { %v3067_v36 = vld [vmem:[#allocation10 + $0xe0] sm:$0xff]  }
 0x263   :  { %v2471_v37 = vpop.f32.mrb[4].mxu1 }
 0x264   :  { %v464_v38 = vpop.f32.mrb[5].mxu1 }
 0x265   :  { %v473_v39 = vmul.f32 %v464_v38, %v464_v38 }
 0x267   :  { %v474_v40 = vsub.f32 %v2471_v37, %v473_v39  ;;  %v3068_v37 = vld [vmem:[#allocation10 + $0xe8] sm:$0xff]   ;;  %v3070_v39 = vld [vmem:[#allocation10 + $0xf8] sm:$0xff]  }
 0x269   :  { %v475_v41 = vmax.f32 %v474_v40, 0.0  ;;  %v2088_v40 = vld [vmem:[%s3757_s5 + $0x8] ss:$0 sm:$0xff] }
 0x26b   :  { %v476_v42 = vadd.f32 1e-05, %v475_v41 }
 0x26d   :  { %3123 = vrsqrt.f32 %v476_v42 }
 0x277   :  { %v3124_v43 = vpop.eup %3123 }
 0x278   :  { %v478_v45 = vmul.f32 %v3124_v43, %v464_v38  ;;  %2504 = vmatprep.mubr.f32.mxu0 %v3124_v43  ;;  %v3069_v38 = vld [vmem:[#allocation10 + $0xf0] sm:$0xff]  }
 0x27a   :  { %2505 = vmatmul.mubr.f32.vlgmr.msra.gmra.mrb[8].mxu0 %v478_v45 }
 0x27b   :  { %2543 = vmatprep.mubr.msk.bf16.mxu0 %vm3311_vm0, %v3310_v0  ;;  %2528 = vmatpush3.bf16.msra.mxu0 %v3055_v2 }
 0x27c   :  { %2529 = vmatprep.subr.bf16.mxu0 %v3310_v0 }
 0x27f   :  { %2530 = vmatpush3.bf16.msra.mxu0 %v3056_v3 }
 0x280   :  { %2531 = vmatprep.subr.bf16.mxu0 %v3310_v0 }
 0x283   :  { %2532 = vmatpush3.bf16.msra.mxu0 %v3057_v4 }
 0x284   :  { %2533 = vmatprep.subr.bf16.mxu0 %v3310_v0 }
 0x287   :  { %2534 = vmatpush3.bf16.msra.mxu0 %v3058_v5 }
 0x288   :  { %2535 = vmatprep.subr.bf16.mxu0 %v3310_v0 }
 0x28b   :  { %2536 = vmatpush3.bf16.msra.mxu0 %v3059_v7 }
 0x28c   :  { %2537 = vmatprep.subr.bf16.mxu0 %v3310_v0 }
 0x28f   :  { %2538 = vmatpush3.bf16.msra.mxu0 %v3060_v9 }
 0x290   :  { %2539 = vmatprep.subr.bf16.mxu0 %v3310_v0 }
 0x293   :  { %2540 = vmatpush3.bf16.msra.mxu0 %v3061_v10 }
 0x294   :  { %2541 = vmatprep.subr.bf16.mxu0 %v3310_v0 }
 0x297   :  { %2542 = vmatpush3.bf16.msra.mxu0 %v3062_v12 }
 0x298   :  { %2892 = vmatprep.subr.bf16.mxu0 %v3451_v25 }
 0x34d   :  { %v2506_v51 = vpop.f32.mrb[8].mxu0 }
 0x34e   :  { %v561_v53 = vpop.f32.mrb[9].mxu0 }
 0x34f   :  { %v570_v54 = vmul.f32 %v561_v53, %v3460_v44 }
 0x351   :  { %v571_v57 = vsub.f32 %v570_v54, %v2506_v51 }
 0x353   :  { %v580_v60 = vmul.f32 %v2073_v56, %v571_v57  ;;  %v2099_v57 = vld [vmem:[%s3757_s5 + $0x9] ss:$0 sm:$0xff] }
 0x355   :  { %v589_v62 = vadd.f32 %v2075_v59, %v580_v60 }
 0x357   :  { %v590_v63 = vpack.c.bf16 %v589_v62, %v589_v62 }
 0x359   :  { %2524 = vmatmul.mubr.bf16.vlgmr.msra.gmra.mrb[8].mxu1 %v590_v63 }
 0x35a   :  { %2563 = vmatprep.mubr.msk.bf16.mxu1 %vm3311_vm0, %v3310_v0  ;;  %2548 = vmatpush3.bf16.msra.mxu1 %v3063_v31 }
 0x35b   :  { %2549 = vmatprep.subr.bf16.mxu1 %v3310_v0 }
 0x35e   :  { %2550 = vmatpush3.bf16.msra.mxu1 %v3064_v32  ;;  %v3076_v32 = vld [vmem:[#allocation10 + $0x128] sm:$0xff]  }
 0x35f   :  { %2551 = vmatprep.subr.bf16.mxu1 %v3310_v0 }
 0x362   :  { %2552 = vmatpush3.bf16.msra.mxu1 %v3065_v34  ;;  %v3077_v34 = vld [vmem:[#allocation10 + $0x130] sm:$0xff]  }
 0x363   :  { %2553 = vmatprep.subr.bf16.mxu1 %v3310_v0 }
 0x366   :  { %2554 = vmatpush3.bf16.msra.mxu1 %v3066_v35  ;;  %v3078_v35 = vld [vmem:[#allocation10 + $0x138] sm:$0xff]  }
 0x367   :  { %2555 = vmatprep.subr.bf16.mxu1 %v3310_v0 }
 0x36a   :  { %2556 = vmatpush3.bf16.msra.mxu1 %v3067_v36 }
 0x36b   :  { %2557 = vmatprep.subr.bf16.mxu1 %v3310_v0 }
 0x36e   :  { %2558 = vmatpush3.bf16.msra.mxu1 %v3068_v37 }
 0x36f   :  { %2559 = vmatprep.subr.bf16.mxu1 %v3310_v0 }
 0x372   :  { %2560 = vmatpush3.bf16.msra.mxu1 %v3069_v38 }
 0x373   :  { %2561 = vmatprep.subr.bf16.mxu1 %v3310_v0 }
 0x376   :  { %2562 = vmatpush3.bf16.msra.mxu1 %v3070_v39  ;;  %v2110_v39 = vld [vmem:[%s3757_s5 + $0x4] ss:$0 sm:$0xff] }
 0x377   :  { %2924 = vmatprep.subr.bf16.mxu1 %v3497_v6 }
 0x42c   :  { %v698_v15 = vpop.f32.mrb[8].mxu1 }
 0x42d   :  { %v699_v16 = vadd.f32 %v2077_v13, %v698_v15  ;;  %v2525_v18 = vpop.f32.mrb[9].mxu1  ;;  %v3071_v15 = vld [vmem:[#allocation10 + $0x100] sm:$0xff]  }
 0x42e   :  { %v701_v19 = vpop.f32.mrb[10].mxu1  ;;  %v3073_v18 = vld [vmem:[#allocation10 + $0x110] sm:$0xff]  }
 0x42f   :  { %v2086_v21 = vmul.f32 -1.442695, %v699_v16  ;;  %v2526_v22 = vpop.f32.mrb[11].mxu1  ;;  %v3075_v19 = vld [vmem:[#allocation10 + $0x120] sm:$0xff]  }
 0x431   :  { %3125 = vpow2.f32 %v2086_v21 }
 0x43b   :  { %v3126_v24 = vpop.eup %3125 }
 0x43c   :  { %v707_v26 = vadd.f32 1.0, %v3126_v24 }
 0x43e   :  { %3127 = vrcp.f32 %v707_v26 }
 0x448   :  { %v3128_v28 = vpop.eup %3127 }
 0x449   :  { %v710_v29 = vmul.f32 %v3128_v28, %v699_v16  ;;  %v3072_v16 = vld [vmem:[#allocation10 + $0x108] sm:$0xff]  }
 0x44b   :  { %v711_v30 = vpack.c.bf16 %v710_v29, %v710_v29 }
 0x44d   :  { %2544 = vmatmul.mubr.bf16.vlgmr.msra.gmra.mrb[12].mxu0 %v711_v30 }
 0x44e   :  { %2894 = vmatpush3.bf16.msra.mxu0 %v3451_v25 }
 0x44f   :  { %2896 = vmatprep.subr.bf16.mxu0 %v3462_v46 }
 0x452   :  { %2898 = vmatpush3.bf16.msra.mxu0 %v3462_v46 }
 0x453   :  { %2900 = vmatprep.subr.bf16.mxu0 %v3467_v49 }
 0x456   :  { %2902 = vmatpush3.bf16.msra.mxu0 %v3467_v49 }
 0x457   :  { %2904 = vmatprep.subr.bf16.mxu0 %v3471_v52 }
 0x45a   :  { %2906 = vmatpush3.bf16.msra.mxu0 %v3471_v52 }
 0x45b   :  { %2908 = vmatprep.subr.bf16.mxu0 %v3475_v55 }
 0x45e   :  { %2910 = vmatpush3.bf16.msra.mxu0 %v3475_v55 }
 0x45f   :  { %2912 = vmatprep.subr.bf16.mxu0 %v3479_v58 }
 0x462   :  { %2914 = vmatpush3.bf16.msra.mxu0 %v3479_v58 }
 0x463   :  { %2916 = vmatprep.subr.bf16.mxu0 %v3483_v61 }
 0x466   :  { %2918 = vmatpush3.bf16.msra.mxu0 %v3483_v61 }
 0x467   :  { %2920 = vmatprep.subr.bf16.mxu0 %v3487_v1 }
 0x46a   :  { %2922 = vmatpush3.bf16.msra.mxu0 %v3487_v1 }
 0x46b   :  { %2637 = vmatprep.subr.bf16.mxu0 %v3310_v0 }
 0x520   :  { %v819_v41 = vpop.f32.mrb[12].mxu0 }
 0x521   :  { %v820_v42 = vadd.f32 %v2088_v40, %v819_v41  ;;  %v2545_v43 = vpop.f32.mrb[13].mxu0  ;;  %v2112_v41 = vld [vmem:[%s3757_s5 + $0x6] ss:$0 sm:$0xff] }
 0x522   :  { %v822_v45 = vpop.f32.mrb[14].mxu0 }
 0x523   :  { %v2097_v47 = vmul.f32 -1.442695, %v820_v42  ;;  %v2546_v48 = vpop.f32.mrb[15].mxu0 }
 0x524   :  { %v3080_v48 = vld [vmem:[#allocation10 + $0x148] sm:$0xff]  }
 0x525   :  { %3129 = vpow2.f32 %v2097_v47  ;;  %v3079_v47 = vld [vmem:[#allocation10 + $0x140] sm:$0xff]  }
 0x52f   :  { %v3130_v50 = vpop.eup %3129 }
 0x530   :  { %v828_v51 = vadd.f32 1.0, %v3130_v50  ;;  %v3081_v50 = vld [vmem:[#allocation10 + $0x150] sm:$0xff]  }
 0x532   :  { %3131 = vrcp.f32 %v828_v51  ;;  %v3082_v51 = vld [vmem:[#allocation10 + $0x158] sm:$0xff]  }
 0x53c   :  { %v3132_v53 = vpop.eup %3131 }
 0x53d   :  { %v831_v54 = vmul.f32 %v3132_v53, %v820_v42  ;;  %v3083_v53 = vld [vmem:[#allocation10 + $0x160] sm:$0xff]  }
 0x53f   :  { %v832_v56 = vpack.c.bf16 %v831_v54, %v831_v54  ;;  %v3084_v54 = vld [vmem:[#allocation10 + $0x168] sm:$0xff]  }
 0x541   :  { %2564 = vmatmul.mubr.bf16.vlgmr.msra.gmra.mrb[12].mxu1 %v832_v56  ;;  %v3085_v56 = vld [vmem:[#allocation10 + $0x170] sm:$0xff]  }
 0x542   :  { %2926 = vmatpush3.bf16.msra.mxu1 %v3497_v6 }
 0x543   :  { %2928 = vmatprep.subr.bf16.mxu1 %v3499_v8 }
 0x546   :  { %2930 = vmatpush3.bf16.msra.mxu1 %v3499_v8 }
 0x547   :  { %2932 = vmatprep.subr.bf16.mxu1 %v3504_v11 }
 0x54a   :  { %2934 = vmatpush3.bf16.msra.mxu1 %v3504_v11 }
 0x54b   :  { %2936 = vmatprep.subr.bf16.mxu1 %v3509_v14 }
 0x54e   :  { %2938 = vmatpush3.bf16.msra.mxu1 %v3509_v14 }
 0x54f   :  { %2940 = vmatprep.subr.bf16.mxu1 %v3513_v17 }
 0x552   :  { %2942 = vmatpush3.bf16.msra.mxu1 %v3513_v17 }
 0x553   :  { %2944 = vmatprep.subr.bf16.mxu1 %v3517_v20 }
 0x556   :  { %2946 = vmatpush3.bf16.msra.mxu1 %v3517_v20 }
 0x557   :  { %2948 = vmatprep.subr.bf16.mxu1 %v3521_v23 }
 0x55a   :  { %2950 = vmatpush3.bf16.msra.mxu1 %v3521_v23 }
 0x55b   :  { %2952 = vmatprep.subr.bf16.mxu1 %v3525_v27 }
 0x55e   :  { %2954 = vmatpush3.bf16.msra.mxu1 %v3525_v27 }
 0x55f   :  { %2657 = vmatprep.subr.bf16.mxu1 %v3310_v0 }
 0x614   :  { %v940_v59 = vpop.f32.mrb[12].mxu1 }
 0x615   :  { %v941_v60 = vadd.f32 %v2099_v57, %v940_v59  ;;  %v2565_v62 = vpop.f32.mrb[13].mxu1  ;;  %v3086_v57 = vld [vmem:[#allocation10 + $0x178] sm:$0xff]  }
 0x616   :  { %v943_v63 = vpop.f32.mrb[14].mxu1  ;;  %v2114_v59 = vld [vmem:[%s3757_s5 + $0xa] ss:$0 sm:$0xff] }
 0x617   :  { %v2108_v2 = vmul.f32 -1.442695, %v941_v60  ;;  %v2566_v3 = vpop.f32.mrb[15].mxu1 }
 0x619   :  { %3133 = vpow2.f32 %v2108_v2 }
 0x623   :  { %v3134_v4 = vpop.eup %3133 }
 0x624   :  { %v949_v5 = vadd.f32 1.0, %v3134_v4 }
 0x626   :  { %3135 = vrcp.f32 %v949_v5 }
 0x630   :  { %v3136_v7 = vpop.eup %3135 }
 0x631   :  { %v952_v9 = vmul.f32 %v3136_v7, %v941_v60 }
 0x633   :  { %v953_v10 = vadd.f32 %v952_v9, %v3460_v44  ;;  %v3074_v44 = vld [vmem:[#allocation10 + $0x118] sm:$0xff]  }
 0x635   :  { %v3609_v12 = vmul.f32 0.70710677, %v953_v10 }
 0x637   :  { %2599 = vmatprep.mubr.f32.mxu0 %v3609_v12  ;;  %v955_v13 = vmul.f32 %v3609_v12, %v3609_v12 }
 0x639   :  { %2600 = vmatmul.mubr.f32.vlgmr.msra.gmra.mrb[10].mxu0 %v955_v13 }
 0x63a   :  { %2653 = vmatprep.mubr.msk.bf16.mxu0 %vm3311_vm0, %v3310_v0  ;;  %2638 = vmatpush3.bf16.msra.mxu0 %v3071_v15  ;;  %v2125_v15 = vld [vmem:[%s3757_s5 + $0xb] ss:$0 sm:$0xff] }
 0x63b   :  { %2639 = vmatprep.subr.bf16.mxu0 %v3310_v0 }
 0x63e   :  { %2640 = vmatpush3.bf16.msra.mxu0 %v3072_v16 }
 0x63f   :  { %2641 = vmatprep.subr.bf16.mxu0 %v3310_v0 }
 0x642   :  { %2642 = vmatpush3.bf16.msra.mxu0 %v3073_v18 }
 0x643   :  { %2643 = vmatprep.subr.bf16.mxu0 %v3310_v0 }
 0x646   :  { %2644 = vmatpush3.bf16.msra.mxu0 %v3074_v44 }
 0x647   :  { %2645 = vmatprep.subr.bf16.mxu0 %v3310_v0 }
 0x64a   :  { %2646 = vmatpush3.bf16.msra.mxu0 %v3075_v19 }
 0x64b   :  { %2647 = vmatprep.subr.bf16.mxu0 %v3310_v0 }
 0x64e   :  { %2648 = vmatpush3.bf16.msra.mxu0 %v3076_v32 }
 0x64f   :  { %2649 = vmatprep.subr.bf16.mxu0 %v3310_v0 }
 0x652   :  { %2650 = vmatpush3.bf16.msra.mxu0 %v3077_v34 }
 0x653   :  { %2651 = vmatprep.subr.bf16.mxu0 %v3310_v0 }
 0x656   :  { %2652 = vmatpush3.bf16.msra.mxu0 %v3078_v35 }
 0x657   :  { %2677 = vmatprep.subr.bf16.mxu0 %v3310_v0 }
 0x70c   :  { %v2601_v21 = vpop.f32.mrb[10].mxu0 }
 0x70d   :  { %v1022_v22 = vpop.f32.mrb[11].mxu0 }
 0x70e   :  { %v1031_v24 = vmul.f32 %v1022_v22, %v1022_v22 }
 0x710   :  { %v1032_v26 = vsub.f32 %v2601_v21, %v1031_v24 }
 0x712   :  { %v1033_v28 = vmax.f32 %v1032_v26, 0.0 }
 0x714   :  { %v1034_v29 = vadd.f32 1e-05, %v1033_v28 }
 0x716   :  { %3137 = vrsqrt.f32 %v1034_v29 }
 0x720   :  { %v3138_v30 = vpop.eup %3137 }
 0x721   :  { %v1036_v31 = vmul.f32 %v3138_v30, %v1022_v22  ;;  %2634 = vmatprep.mubr.f32.mxu1 %v3138_v30 }
 0x723   :  { %2635 = vmatmul.mubr.f32.vlgmr.msra.gmra.mrb[6].mxu1 %v1036_v31 }
 0x724   :  { %2673 = vmatprep.mubr.msk.bf16.mxu1 %vm3311_vm0, %v3310_v0  ;;  %2658 = vmatpush3.bf16.msra.mxu1 %v3079_v47 }
 0x725   :  { %2659 = vmatprep.subr.bf16.mxu1 %v3310_v0 }
 0x728   :  { %2660 = vmatpush3.bf16.msra.mxu1 %v3080_v48 }
 0x729   :  { %2661 = vmatprep.subr.bf16.mxu1 %v3310_v0 }
 0x72c   :  { %2662 = vmatpush3.bf16.msra.mxu1 %v3081_v50 }
 0x72d   :  { %2663 = vmatprep.subr.bf16.mxu1 %v3310_v0 }
 0x730   :  { %2664 = vmatpush3.bf16.msra.mxu1 %v3082_v51 }
 0x731   :  { %2665 = vmatprep.subr.bf16.mxu1 %v3310_v0 }
 0x734   :  { %2666 = vmatpush3.bf16.msra.mxu1 %v3083_v53 }
 0x735   :  { %2667 = vmatprep.subr.bf16.mxu1 %v3310_v0 }
 0x738   :  { %2668 = vmatpush3.bf16.msra.mxu1 %v3084_v54 }
 0x739   :  { %2669 = vmatprep.subr.bf16.mxu1 %v3310_v0 }
 0x73c   :  { %2670 = vmatpush3.bf16.msra.mxu1 %v3085_v56 }
 0x73d   :  { %2671 = vmatprep.subr.bf16.mxu1 %v3310_v0 }
 0x740   :  { %2672 = vmatpush3.bf16.msra.mxu1 %v3086_v57  ;;  %v3100_v57 = vld [vmem:[#allocation10 + $0x1e8] sm:$0xff]  }
 0x741   :  { %2956 = vmatprep.subr.bf16.mxu1 %v3451_v25 }
 0x7f6   :  { %v2636_v36 = vpop.f32.mrb[6].mxu1 }
 0x7f7   :  { %v1103_v37 = vpop.f32.mrb[7].mxu1 }
 0x7f8   :  { %v1112_v38 = vmul.f32 %v1103_v37, %v3609_v12 }
 0x7fa   :  { %v1113_v40 = vsub.f32 %v1112_v38, %v2636_v36 }
 0x7fc   :  { %v1122_v42 = vmul.f32 %v2110_v39, %v1113_v40 }
 0x7fe   :  { %v1131_v43 = vadd.f32 %v2112_v41, %v1122_v42  ;;  %v3095_v41 = vld [vmem:[#allocation10 + $0x1c0] sm:$0xff]   ;;  %v3096_v42 = vld [vmem:[#allocation10 + $0x1c8] sm:$0xff]  }
 0x800   :  { %v1132_v45 = vpack.c.bf16 %v1131_v43, %v1131_v43  ;;  %v3097_v43 = vld [vmem:[#allocation10 + $0x1d0] sm:$0xff]  }
 0x802   :  { %2654 = vmatmul.mubr.bf16.vlgmr.msra.gmra.mrb[16].mxu0 %v1132_v45 }
 0x803   :  { %2693 = vmatprep.mubr.msk.bf16.mxu0 %vm3311_vm0, %v3310_v0 }
 0x8d5   :  { %v1240_v60 = vpop.f32.mrb[16].mxu0 }
 0x8d6   :  { %v1241_v62 = vadd.f32 %v2114_v59, %v1240_v60  ;;  %v2655_v63 = vpop.f32.mrb[17].mxu0  ;;  %v3101_v59 = vld [vmem:[#allocation10 + $0x1f0] sm:$0xff]   ;;  %v3102_v60 = vld [vmem:[#allocation10 + $0x1f8] sm:$0xff]  }
 0x8d7   :  { %v1243_v2 = vpop.f32.mrb[18].mxu0 }
 0x8d8   :  { %v2123_v3 = vmul.f32 -1.442695, %v1241_v62  ;;  %v2656_v4 = vpop.f32.mrb[19].mxu0 }
 0x8da   :  { %3139 = vpow2.f32 %v2123_v3  ;;  %v2147_v3 = vld [vmem:[%s3757_s5 + $0xd] ss:$0 sm:$0xff] }
 0x8e4   :  { %v3140_v5 = vpop.eup %3139 }
 0x8e5   :  { %v1249_v7 = vadd.f32 1.0, %v3140_v5  ;;  %v2149_v5 = vld [vmem:[%s3757_s5 + $0xe] ss:$0 sm:$0xff] }
 0x8e7   :  { %3141 = vrcp.f32 %v1249_v7 }
 0x8f1   :  { %v3142_v9 = vpop.eup %3141 }
 0x8f2   :  { %v1252_v10 = vmul.f32 %v3142_v9, %v1241_v62 }
 0x8f4   :  { %v1253_v13 = vpack.c.bf16 %v1252_v10, %v1252_v10 }
 0x8f6   :  { %2674 = vmatmul.mubr.bf16.vlgmr.msra.gmra.mrb[16].mxu1 %v1253_v13  ;;  %v3103_v13 = vld [vmem:[#allocation10 + $0x200] sm:$0xff]  }
 0x8f7   :  { %2958 = vmatpush3.bf16.msra.mxu1 %v3451_v25  ;;  %v3087_v25 = vld [vmem:[#allocation10 + $0x180] sm:$0xff]  }
 0x8f8   :  { %2960 = vmatprep.subr.bf16.mxu1 %v3462_v46  ;;  %2678 = vmatpush3.bf16.msra.mxu0 %v3087_v25  ;;  %v3104_v25 = vld [vmem:[#allocation10 + $0x208] sm:$0xff]  }
 0x8f9   :  { %2679 = vmatprep.subr.bf16.mxu0 %v3310_v0 }
 0x8fb   :  { %2962 = vmatpush3.bf16.msra.mxu1 %v3462_v46  ;;  %v3088_v46 = vld [vmem:[#allocation10 + $0x188] sm:$0xff]  }
 0x8fc   :  { %2964 = vmatprep.subr.bf16.mxu1 %v3467_v49  ;;  %2680 = vmatpush3.bf16.msra.mxu0 %v3088_v46  ;;  %v3105_v46 = vld [vmem:[#allocation10 + $0x210] sm:$0xff]  }
 0x8fd   :  { %2681 = vmatprep.subr.bf16.mxu0 %v3310_v0 }
 0x8ff   :  { %2966 = vmatpush3.bf16.msra.mxu1 %v3467_v49  ;;  %v3089_v49 = vld [vmem:[#allocation10 + $0x190] sm:$0xff]  }
 0x900   :  { %2968 = vmatprep.subr.bf16.mxu1 %v3471_v52  ;;  %2682 = vmatpush3.bf16.msra.mxu0 %v3089_v49  ;;  %v3106_v49 = vld [vmem:[#allocation10 + $0x218] sm:$0xff]  }
 0x901   :  { %2683 = vmatprep.subr.bf16.mxu0 %v3310_v0 }
 0x903   :  { %2970 = vmatpush3.bf16.msra.mxu1 %v3471_v52  ;;  %v3090_v52 = vld [vmem:[#allocation10 + $0x198] sm:$0xff]  }
 0x904   :  { %2972 = vmatprep.subr.bf16.mxu1 %v3475_v55  ;;  %2684 = vmatpush3.bf16.msra.mxu0 %v3090_v52  ;;  %v3107_v52 = vld [vmem:[#allocation10 + $0x220] sm:$0xff]  }
 0x905   :  { %2685 = vmatprep.subr.bf16.mxu0 %v3310_v0 }
 0x907   :  { %2974 = vmatpush3.bf16.msra.mxu1 %v3475_v55  ;;  %v3091_v55 = vld [vmem:[#allocation10 + $0x1a0] sm:$0xff]  }
 0x908   :  { %2976 = vmatprep.subr.bf16.mxu1 %v3479_v58  ;;  %2686 = vmatpush3.bf16.msra.mxu0 %v3091_v55  ;;  %v3108_v55 = vld [vmem:[#allocation10 + $0x228] sm:$0xff]  }
 0x909   :  { %2687 = vmatprep.subr.bf16.mxu0 %v3310_v0 }
 0x90b   :  { %2978 = vmatpush3.bf16.msra.mxu1 %v3479_v58  ;;  %v3092_v58 = vld [vmem:[#allocation10 + $0x1a8] sm:$0xff]  }
 0x90c   :  { %2980 = vmatprep.subr.bf16.mxu1 %v3483_v61  ;;  %2688 = vmatpush3.bf16.msra.mxu0 %v3092_v58  ;;  %v3109_v58 = vld [vmem:[#allocation10 + $0x230] sm:$0xff]  }
 0x90d   :  { %2689 = vmatprep.subr.bf16.mxu0 %v3310_v0 }
 0x90f   :  { %2982 = vmatpush3.bf16.msra.mxu1 %v3483_v61  ;;  %v3093_v61 = vld [vmem:[#allocation10 + $0x1b0] sm:$0xff]  }
 0x910   :  { %2984 = vmatprep.subr.bf16.mxu1 %v3487_v1  ;;  %2690 = vmatpush3.bf16.msra.mxu0 %v3093_v61  ;;  %v3110_v61 = vld [vmem:[#allocation10 + $0x238] sm:$0xff]  }
 0x911   :  { %2691 = vmatprep.subr.bf16.mxu0 %v3310_v0 }
 0x913   :  { %2986 = vmatpush3.bf16.msra.mxu1 %v3487_v1  ;;  %v3094_v1 = vld [vmem:[#allocation10 + $0x1b8] sm:$0xff]  }
 0x914   :  { %2767 = vmatprep.subr.bf16.mxu1 %v3310_v0  ;;  %2692 = vmatpush3.bf16.msra.mxu0 %v3094_v1  ;;  %v2151_v1 = vld [vmem:[%s3757_s5 + $0xf] ss:$0 sm:$0xff] }
 0x915   :  { %2988 = vmatprep.subr.bf16.mxu0 %v3497_v6 }
 0x9c9   :  { %v1361_v16 = vpop.f32.mrb[16].mxu1 }
 0x9ca   :  { %v1362_v18 = vadd.f32 %v2125_v15, %v1361_v16  ;;  %v2675_v44 = vpop.f32.mrb[17].mxu1 }
 0x9cb   :  { %v1364_v19 = vpop.f32.mrb[18].mxu1 }
 0x9cc   :  { %v2134_v21 = vmul.f32 -1.442695, %v1362_v18  ;;  %v2676_v22 = vpop.f32.mrb[19].mxu1 }
 0x9ce   :  { %3143 = vpow2.f32 %v2134_v21 }
 0x9d8   :  { %v3144_v24 = vpop.eup %3143 }
 0x9d9   :  { %v1370_v26 = vadd.f32 1.0, %v3144_v24 }
 0x9db   :  { %3145 = vrcp.f32 %v1370_v26 }
 0x9e5   :  { %v3146_v28 = vpop.eup %3145 }
 0x9e6   :  { %v1373_v29 = vmul.f32 %v3146_v28, %v1362_v18 }
 0x9e8   :  { %v1374_v30 = vpack.c.bf16 %v1373_v29, %v1373_v29 }
 0x9ea   :  { %2694 = vmatmul.mubr.bf16.vlgmr.msra.gmra.mrb[20].mxu0 %v1374_v30  ;;  %v3111_v30 = vld [vmem:[#allocation10 + $0x240] sm:$0xff]  }
 0x9eb   :  { %2990 = vmatpush3.bf16.msra.mxu0 %v3497_v6  ;;  %v2136_v6 = vld [vmem:[%s3757_s5 + $0xc] ss:$0 sm:$0xff] }
 0x9ec   :  { %2992 = vmatprep.subr.bf16.mxu0 %v3499_v8 }
 0x9ef   :  { %2994 = vmatpush3.bf16.msra.mxu0 %v3499_v8 }
 0x9f0   :  { %2996 = vmatprep.subr.bf16.mxu0 %v3504_v11 }
 0x9f3   :  { %2998 = vmatpush3.bf16.msra.mxu0 %v3504_v11 }
 0x9f4   :  { %3000 = vmatprep.subr.bf16.mxu0 %v3509_v14 }
 0x9f7   :  { %3002 = vmatpush3.bf16.msra.mxu0 %v3509_v14 }
 0x9f8   :  { %3004 = vmatprep.subr.bf16.mxu0 %v3513_v17 }
 0x9fb   :  { %3006 = vmatpush3.bf16.msra.mxu0 %v3513_v17 }
 0x9fc   :  { %3008 = vmatprep.subr.bf16.mxu0 %v3517_v20 }
 0x9ff   :  { %3010 = vmatpush3.bf16.msra.mxu0 %v3517_v20 }
 0xa00   :  { %3012 = vmatprep.subr.bf16.mxu0 %v3521_v23 }
 0xa03   :  { %3014 = vmatpush3.bf16.msra.mxu0 %v3521_v23 }
 0xa04   :  { %3016 = vmatprep.subr.bf16.mxu0 %v3525_v27 }
 0xa07   :  { %3018 = vmatpush3.bf16.msra.mxu0 %v3525_v27  ;;  %v2061_v27 = vld [vmem:[%s3757_s5 + $0x2] ss:$0 sm:$0xff] }
 0xa08   :  { %2787 = vmatprep.subr.bf16.mxu0 %v3310_v0  ;;  %v318_v37 = vadd.f32 %v2061_v27, %v3535_v33  ;;  %v3099_v33 = vld [vmem:[#allocation10 + $0x1e0] sm:$0xff]  }
 0xabd   :  { %v1482_v8 = vpop.f32.mrb[20].mxu0 }
 0xabe   :  { %v1483_v11 = vadd.f32 %v2136_v6, %v1482_v8  ;;  %v2695_v14 = vpop.f32.mrb[21].mxu0  ;;  %v3112_v6 = vld [vmem:[#allocation10 + $0x248] sm:$0xff]   ;;  %v3113_v8 = vld [vmem:[#allocation10 + $0x250] sm:$0xff]  }
 0xabf   :  { %v1485_v17 = vpop.f32.mrb[22].mxu0  ;;  %v3115_v14 = vld [vmem:[#allocation10 + $0x260] sm:$0xff]  }
 0xac0   :  { %v2145_v31 = vmul.f32 -1.442695, %v1483_v11  ;;  %v2696_v20 = vpop.f32.mrb[23].mxu0  ;;  %v3116_v17 = vld [vmem:[#allocation10 + $0x268] sm:$0xff]  }
 0xac1   :  { %v3118_v20 = vld [vmem:[#allocation10 + $0x278] sm:$0xff]  }
 0xac2   :  { %3147 = vpow2.f32 %v2145_v31  ;;  %v3117_v31 = vld [vmem:[#allocation10 + $0x270] sm:$0xff]  }
 0xacc   :  { %v3148_v32 = vpop.eup %3147 }
 0xacd   :  { %v1491_v34 = vadd.f32 1.0, %v3148_v32  ;;  %v2162_v32 = vld [vmem:[%s3757_s5 + $0x10] ss:$0 sm:$0xff] }
 0xacf   :  { %3149 = vrcp.f32 %v1491_v34 }
 0xad9   :  { %v3150_v23 = vpop.eup %3149 }
 0xada   :  { %v1494_v35 = vmul.f32 %v3150_v23, %v1483_v11  ;;  %v3114_v11 = vld [vmem:[#allocation10 + $0x258] sm:$0xff]  }
 0xadc   :  { %v1495_v36 = vadd.f32 %v1494_v35, %v3609_v12  ;;  %v3098_v12 = vld [vmem:[#allocation10 + $0x1d8] sm:$0xff]  }
 0xade   :  { %v1496_v38 = vmul.f32 0.70710677, %v1495_v36 }
 0xae0   :  { %v1497_v39 = vadd.f32 %v1496_v38, %v318_v37 }
 0xae2   :  { %2729 = vmatprep.mubr.f32.mxu1 %v1497_v39  ;;  %v1498_v40 = vmul.f32 %v1497_v39, %v1497_v39 }
 0xae4   :  { %2730 = vmatmul.mubr.f32.vlgmr.msra.gmra.mrb[20].mxu1 %v1498_v40 }
 0xae5   :  { %2783 = vmatprep.mubr.msk.bf16.mxu1 %vm3311_vm0, %v3310_v0  ;;  %2768 = vmatpush3.bf16.msra.mxu1 %v3095_v41 }
 0xae6   :  { %2769 = vmatprep.subr.bf16.mxu1 %v3310_v0 }
 0xae9   :  { %2770 = vmatpush3.bf16.msra.mxu1 %v3096_v42 }
 0xaea   :  { %2771 = vmatprep.subr.bf16.mxu1 %v3310_v0 }
 0xaed   :  { %2772 = vmatpush3.bf16.msra.mxu1 %v3097_v43 }
 0xaee   :  { %2773 = vmatprep.subr.bf16.mxu1 %v3310_v0 }
 0xaf1   :  { %2774 = vmatpush3.bf16.msra.mxu1 %v3098_v12 }
 0xaf2   :  { %2775 = vmatprep.subr.bf16.mxu1 %v3310_v0 }
 0xaf5   :  { %2776 = vmatpush3.bf16.msra.mxu1 %v3099_v33 }
 0xaf6   :  { %2777 = vmatprep.subr.bf16.mxu1 %v3310_v0 }
 0xaf9   :  { %2778 = vmatpush3.bf16.msra.mxu1 %v3100_v57 }
 0xafa   :  { %2779 = vmatprep.subr.bf16.mxu1 %v3310_v0 }
 0xafd   :  { %2780 = vmatpush3.bf16.msra.mxu1 %v3101_v59 }
 0xafe   :  { %2781 = vmatprep.subr.bf16.mxu1 %v3310_v0 }
 0xb01   :  { %2782 = vmatpush3.bf16.msra.mxu1 %v3102_v60 }
 0xb02   :  { %2807 = vmatprep.subr.bf16.mxu1 %v3310_v0 }
 0xbb7   :  { %v2731_v45 = vpop.f32.mrb[20].mxu1 }
 0xbb8   :  { %v1565_v47 = vpop.f32.mrb[21].mxu1 }
 0xbb9   :  { %v1574_v48 = vmul.f32 %v1565_v47, %v1565_v47 }
 0xbbb   :  { %v1575_v50 = vsub.f32 %v2731_v45, %v1574_v48 }
 0xbbd   :  { %v1576_v51 = vmax.f32 %v1575_v50, 0.0 }
 0xbbf   :  { %v1577_v53 = vadd.f32 1e-05, %v1576_v51 }
 0xbc1   :  { %3151 = vrsqrt.f32 %v1577_v53 }
 0xbcb   :  { %v3152_v54 = vpop.eup %3151 }
 0xbcc   :  { %v1579_v56 = vmul.f32 %v3152_v54, %v1565_v47  ;;  %2764 = vmatprep.mubr.f32.mxu0 %v3152_v54 }
 0xbce   :  { %2765 = vmatmul.mubr.f32.vlgmr.msra.gmra.mrb[24].mxu0 %v1579_v56 }
 0xbcf   :  { %2803 = vmatprep.mubr.msk.bf16.mxu0 %vm3311_vm0, %v3310_v0  ;;  %2788 = vmatpush3.bf16.msra.mxu0 %v3103_v13 }
 0xbd0   :  { %2789 = vmatprep.subr.bf16.mxu0 %v3310_v0 }
 0xbd3   :  { %2790 = vmatpush3.bf16.msra.mxu0 %v3104_v25 }
 0xbd4   :  { %2791 = vmatprep.subr.bf16.mxu0 %v3310_v0 }
 0xbd7   :  { %2792 = vmatpush3.bf16.msra.mxu0 %v3105_v46 }
 0xbd8   :  { %2793 = vmatprep.subr.bf16.mxu0 %v3310_v0 }
 0xbdb   :  { %2794 = vmatpush3.bf16.msra.mxu0 %v3106_v49 }
 0xbdc   :  { %2795 = vmatprep.subr.bf16.mxu0 %v3310_v0 }
 0xbdf   :  { %2796 = vmatpush3.bf16.msra.mxu0 %v3107_v52 }
 0xbe0   :  { %2797 = vmatprep.subr.bf16.mxu0 %v3310_v0 }
 0xbe3   :  { %2798 = vmatpush3.bf16.msra.mxu0 %v3108_v55 }
 0xbe4   :  { %2799 = vmatprep.subr.bf16.mxu0 %v3310_v0 }
 0xbe7   :  { %2800 = vmatpush3.bf16.msra.mxu0 %v3109_v58 }
 0xbe8   :  { %2801 = vmatprep.subr.bf16.mxu0 %v3310_v0 }
 0xbeb   :  { %2802 = vmatpush3.bf16.msra.mxu0 %v3110_v61 }
 0xca1   :  { %v2766_v62 = vpop.f32.mrb[24].mxu0 }
 0xca2   :  { %v1646_v63 = vpop.f32.mrb[25].mxu0 }
 0xca3   :  { %v1655_v2 = vmul.f32 %v1646_v63, %v1497_v39 }
 0xca5   :  { %v1656_v4 = vsub.f32 %v1655_v2, %v2766_v62 }
 0xca7   :  { %v1665_v7 = vmul.f32 %v2147_v3, %v1656_v4 }
 0xca9   :  { %v1674_v9 = vadd.f32 %v2149_v5, %v1665_v7 }
 0xcab   :  { %v1675_v10 = vpack.c.bf16 %v1674_v9, %v1674_v9 }
 0xcad   :  { %2784 = vmatmul.mubr.bf16.vlgmr.msra.gmra.mrb[24].mxu1 %v1675_v10 }
 0xcae   :  { %2823 = vmatprep.mubr.msk.bf16.mxu1 %vm3311_vm0, %v3310_v0  ;;  %2808 = vmatpush3.bf16.msra.mxu1 %v3111_v30 }
 0xcaf   :  { %2809 = vmatprep.subr.bf16.mxu1 %v3310_v0 }
 0xcb2   :  { %2810 = vmatpush3.bf16.msra.mxu1 %v3112_v6 }
 0xcb3   :  { %2811 = vmatprep.subr.bf16.mxu1 %v3310_v0 }
 0xcb6   :  { %2812 = vmatpush3.bf16.msra.mxu1 %v3113_v8 }
 0xcb7   :  { %2813 = vmatprep.subr.bf16.mxu1 %v3310_v0 }
 0xcba   :  { %2814 = vmatpush3.bf16.msra.mxu1 %v3114_v11 }
 0xcbb   :  { %2815 = vmatprep.subr.bf16.mxu1 %v3310_v0 }
 0xcbe   :  { %2816 = vmatpush3.bf16.msra.mxu1 %v3115_v14 }
 0xcbf   :  { %2817 = vmatprep.subr.bf16.mxu1 %v3310_v0 }
 0xcc2   :  { %2818 = vmatpush3.bf16.msra.mxu1 %v3116_v17 }
 0xcc3   :  { %2819 = vmatprep.subr.bf16.mxu1 %v3310_v0 }
 0xcc6   :  { %2820 = vmatpush3.bf16.msra.mxu1 %v3117_v31 }
 0xcc7   :  { %2821 = vmatprep.subr.bf16.mxu1 %v3310_v0  ;;  %v2173_v0 = vld [vmem:[%s3757_s5 + $0x11] ss:$0 sm:$0xff] }
 0xcca   :  { %2822 = vmatpush3.bf16.msra.mxu1 %v3118_v20 }
 0xd80   :  { %v1783_v15 = vpop.f32.mrb[24].mxu1 }
 0xd81   :  { %v1784_v16 = vadd.f32 %v2151_v1, %v1783_v15  ;;  %v2785_v18 = vpop.f32.mrb[25].mxu1 }
 0xd82   :  { %v1786_v44 = vpop.f32.mrb[26].mxu1 }
 0xd83   :  { %v2160_v19 = vmul.f32 -1.442695, %v1784_v16  ;;  %v2786_v21 = vpop.f32.mrb[27].mxu1 }
 0xd85   :  { %3153 = vpow2.f32 %v2160_v19 }
 0xd8f   :  { %v3154_v22 = vpop.eup %3153 }
 0xd90   :  { %v1792_v24 = vadd.f32 1.0, %v3154_v22 }
 0xd92   :  { %3155 = vrcp.f32 %v1792_v24 }
 0xd9c   :  { %v3156_v26 = vpop.eup %3155 }
 0xd9d   :  { %v1795_v28 = vmul.f32 %v3156_v26, %v1784_v16 }
 0xd9f   :  { %v1796_v29 = vpack.c.bf16 %v1795_v28, %v1795_v28 }
 0xda1   :  { %2804 = vmatmul.mubr.bf16.vlgmr.msra.gmra.mrb[28].mxu0 %v1796_v29 }
 0xe74   :  { %v1904_v34 = vpop.f32.mrb[28].mxu0 }
 0xe75   :  { %v1905_v23 = vadd.f32 %v2162_v32, %v1904_v34  ;;  %v2805_v35 = vpop.f32.mrb[29].mxu0 }
 0xe76   :  { %v1907_v27 = vpop.f32.mrb[30].mxu0 }
 0xe77   :  { %v2171_v36 = vmul.f32 -1.442695, %v1905_v23  ;;  %v2806_v37 = vpop.f32.mrb[31].mxu0 }
 0xe79   :  { %3157 = vpow2.f32 %v2171_v36 }
 0xe83   :  { %v3158_v38 = vpop.eup %3157 }
 0xe84   :  { %v1913_v39 = vadd.f32 1.0, %v3158_v38 }
 0xe86   :  { %3159 = vrcp.f32 %v1913_v39 }
 0xe90   :  { %v3160_v40 = vpop.eup %3159 }
 0xe91   :  { %v1916_v41 = vmul.f32 %v3160_v40, %v1905_v23 }
 0xe93   :  { %v1917_v42 = vpack.c.bf16 %v1916_v41, %v1916_v41 }
 0xe95   :  { %2824 = vmatmul.mubr.bf16.vlgmr.msra.gmra.mrb[28].mxu1 %v1917_v42 }
 0xf68   :  { %v2025_v43 = vpop.f32.mrb[28].mxu1 }
 0xf69   :  { %v2026_v12 = vadd.f32 %v2173_v0, %v2025_v43  ;;  %v2825_v33 = vpop.f32.mrb[29].mxu1 }
 0xf6a   :  { %v2028_v45 = vpop.f32.mrb[30].mxu1 }
 0xf6b   :  { %2031 = vst [vmem:[#allocation11] sm:$0xff] %v2026_v12  ;;  %v2826_v47 = vpop.f32.mrb[31].mxu1 }
 0xf6c   :  { %3282 = shalt.err (!%p3279_p2)
}
 0xf6d   :  { %s3283_s5 = scalar_lea.hbm %s3758_s6, 128 }
 0xf6e   :  { %p3284_p3 = scmp.ne.s32.totalorder %s3758_s6, %s3283_s5  ;;  %p3287_p4 = scmp.lt.u32.totalorder %s3283_s5, %s3758_s6 }
 0xf70   :  { %p3289_p5 = pnand %p3287_p4, %p3284_p3 }
 0xf72   :  { %3292 = shalt.err (!%p3289_p5)
}
 0xf73   :  { %2041 = dma.vmem_to_hbm [thread:$0]  %s2039_s14, 128, %s3758_s6, [#allocation4]  }
 0xf74   :  { %3299 = dma.done.wait [#allocation4], 128  }
 0xf75   :  { %3300 = vsyncadd [#allocation4], 4294967168 }
 0xf76   :  { %2045 = vsyncpa [#allocation3], 1 }
 0xf77   :  { %2046 = vsyncpa [#allocation6], 1 }
 0xf78   :  { %2047 = vsyncpa [#allocation9], 1 }
 0xf79   :  { %2048 = vsyncpa [#allocation4], 1 }

</bundles_post_ra>
